<compile_context>
chip_gen: v7x
topology: tpu7x:2x2x1
jax: 0.10.0
libtpu: 0.0.40
codegen_flags: <defaults>
</compile_context>

<pallas_src>
from functools import partial

import jax
import jax.numpy as jnp
from jax.experimental import pallas as pl
from jax.experimental.pallas import tpu as pltpu


def _fused_stem_kernel(xcols_ref, w1_ref, b1_ref, w2_ref, b2_ref, o_ref,
                       p1h_scr, p2h_scr, *, K, Hc1, Wc1, C1, Hc2, Wc2, C2, bblk):
    """Fused conv1(k5) -> maxpool2 -> conv2(k5) -> maxpool2 for one batch block.

    xcols_ref: (bblk, Hc1, Wc1, K*K)  f32   conv1 im2col patches (built in wrapper)
    w1_ref:    (K*K, C1)              f32   conv1 weights, row = kh*K + kw
    b1_ref:    (1, 1, 1, C1)          f32
    w2_ref:    (K*K*C1, C2)           bf16  conv2 weights, row = (kh*K+kw)*C1 + ci
    b2_ref:    (1, 1, 1, C2)          f32
    o_ref:     (bblk, Hp2, Wp2, C2)
    p1h_scr:   (bblk, Hp1, Wc1, C1)   f32   row-pooled conv1 (for strided W-pool reads)
    p2h_scr:   (bblk, Hp2, Wc2, C2)   f32   row-pooled conv2
    """
    Hp1, Wp1 = Hc1 // 2, Wc1 // 2
    Hp2, Wp2 = Hc2 // 2, Wc2 // 2

    # ---- conv1: one MXU matmul over the K*K im2col taps, f32 accumulation ----
    lhs1 = xcols_ref[...].reshape(bblk * Hc1 * Wc1, K * K)
    y1 = jnp.dot(lhs1, w1_ref[...], preferred_element_type=jnp.float32)
    y1 = y1.reshape(bblk, Hc1, Wc1, C1)

    # ---- pool1: 2x2 stride 2.  H pooled in registers (major-dim split + max),
    #      W pooled via stride-2 sublane reads of the (already 2x smaller) scratch.
    #      Bias added after pooling (commutes with per-channel max).
    y1 = y1.reshape(bblk, Hp1, 2, Wc1, C1)
    p1h_scr[...] = jnp.maximum(y1[:, :, 0], y1[:, :, 1])            # (bblk,Hp1,Wc1,C1)
    p1 = jnp.maximum(p1h_scr[:, :, pl.ds(0, Wp1, 2), :],
                     p1h_scr[:, :, pl.ds(1, Wp1, 2), :]) + b1_ref[...]

    # ---- conv2: single deep-K im2col contraction (K*K*C1 = 800) on the MXU ----
    slabs = [p1[:, kh:kh + Hc2, kw:kw + Wc2, :]
             for kh in range(K) for kw in range(K)]
    lhs2 = jnp.concatenate(slabs, axis=-1)                          # (bblk,Hc2,Wc2,K*K*C1)
    lhs2 = lhs2.reshape(bblk * Hc2 * Wc2, K * K * C1).astype(jnp.bfloat16)
    y2 = jnp.dot(lhs2, w2_ref[...], preferred_element_type=jnp.float32)
    y2 = y2.reshape(bblk, Hc2, Wc2, C2)

    # ---- pool2 + bias ----
    y2 = y2.reshape(bblk, Hp2, 2, Wc2, C2)
    p2h_scr[...] = jnp.maximum(y2[:, :, 0], y2[:, :, 1])            # (bblk,Hp2,Wc2,C2)
    p2 = jnp.maximum(p2h_scr[:, :, pl.ds(0, Wp2, 2), :],
                     p2h_scr[:, :, pl.ds(1, Wp2, 2), :]) + b2_ref[...]
    o_ref[...] = p2.astype(o_ref.dtype)


def fused_conv_pool_stem(x_cols, w1_flat, b1, w2_flat, b2, *, K, C1, C2):
    """x_cols: (B, Hc1, Wc1, K*K) f32 conv1 im2col -> (B, Hp2, Wp2, C2)."""
    B, Hc1, Wc1, KK = x_cols.shape
    assert KK == K * K
    assert Hc1 % 2 == 0 and Wc1 % 2 == 0, "pooling assumes even conv1 output"
    Hp1, Wp1 = Hc1 // 2, Wc1 // 2
    Hc2, Wc2 = Hp1 - K + 1, Wp1 - K + 1
    assert Hc2 > 0 and Wc2 > 0 and Hc2 % 2 == 0 and Wc2 % 2 == 0

    Hp2, Wp2 = Hc2 // 2, Wc2 // 2

    # Batch block: amortize per-grid-step overhead, but keep >= 2 grid steps so the
    # "parallel" batch axis can shard across both TensorCores on v7x.
    bblk = max(1, min(8, B // 2)) if B >= 2 else 1
    while B % bblk:
        bblk -= 1

    b1_4 = b1.reshape(1, 1, 1, C1).astype(jnp.float32)
    b2_4 = b2.reshape(1, 1, 1, C2).astype(jnp.float32)

    kernel = partial(_fused_stem_kernel, K=K, Hc1=Hc1, Wc1=Wc1, C1=C1,
                     Hc2=Hc2, Wc2=Wc2, C2=C2, bblk=bblk)

    return pl.pallas_call(
        kernel,
        out_shape=jax.ShapeDtypeStruct((B, Hp2, Wp2, C2), x_cols.dtype),
        grid_spec=pltpu.PrefetchScalarGridSpec(
            num_scalar_prefetch=0,
            grid=(B // bblk,),
            in_specs=[
                pl.BlockSpec((bblk, Hc1, Wc1, KK), lambda i: (i, 0, 0, 0)),
                pl.BlockSpec((K * K, C1), lambda i: (0, 0)),
                pl.BlockSpec((1, 1, 1, C1), lambda i: (0, 0, 0, 0)),
                pl.BlockSpec((K * K * C1, C2), lambda i: (0, 0)),
                pl.BlockSpec((1, 1, 1, C2), lambda i: (0, 0, 0, 0)),
            ],
            out_specs=pl.BlockSpec((bblk, Hp2, Wp2, C2), lambda i: (i, 0, 0, 0)),
            scratch_shapes=[
                pltpu.VMEM((bblk, Hp1, Wc1, C1), jnp.float32),
                pltpu.VMEM((bblk, Hp2, Wc2, C2), jnp.float32),
            ],
        ),
        compiler_params=pltpu.CompilerParams(
            dimension_semantics=("parallel",),      # batch axis: v7x dual-TC sharding
        ),
    )(x_cols, w1_flat, b1_4, w2_flat, b2_4)


def init_params(key):
    """Deterministic parameter init (PyTorch-default-like uniform(+-1/sqrt(fan_in)))."""
    k1, k2, k3, k4 = jax.random.split(key, 4)
    lim1 = 1.0 / (1 * 5 * 5) ** 0.5
    lim2 = 1.0 / (32 * 5 * 5) ** 0.5
    return {
        "w1": jax.random.uniform(k1, (5, 5, 1, 32), jnp.float32, -lim1, lim1),   # HWIO
        "b1": jax.random.uniform(k2, (32,), jnp.float32, -lim1, lim1),
        "w2": jax.random.uniform(k3, (5, 5, 32, 64), jnp.float32, -lim2, lim2),  # HWIO
        "b2": jax.random.uniform(k4, (64,), jnp.float32, -lim2, lim2),
    }


@jax.jit
def m2_stem_forward(x_nchw, params):
    """Matches M_2_stem.forward: returns NCHW output (B, 64, H_out, W_out)."""
    K = params["w1"].shape[0]
    C1 = params["w1"].shape[-1]
    C2 = params["w2"].shape[-1]

    x = x_nchw[:, 0, :, :]                                    # squeeze Cin=1 -> (B,H,W)
    B, H, W = x.shape
    Hc1, Wc1 = H - K + 1, W - K + 1

    # conv1 im2col built in the wrapper: pure layout plumbing (no FLOPs).  It gives
    # the fused kernel a dense 25-lane LHS so conv1 also runs on the MXU, instead of
    # 1-lane-wide NHWC taps wasting ~128x of DMA/vld bandwidth.
    x_cols = jnp.stack([x[:, kh:kh + Hc1, kw:kw + Wc1]
                        for kh in range(K) for kw in range(K)], axis=-1)  # (B,Hc1,Wc1,25)

    w1_flat = params["w1"].reshape(K * K, C1)                             # f32 (25, 32)
    w2_flat = params["w2"].reshape(K * K * params["w2"].shape[2], C2)     # (800, 64)
    w2_flat = w2_flat.astype(jnp.bfloat16)                                # MXU-native operands

    y = fused_conv_pool_stem(x_cols, w1_flat, params["b1"],
                             w2_flat, params["b2"], K=K, C1=C1, C2=C2)    # (B,4,4,64)
    return jnp.transpose(y, (0, 3, 1, 2))                                 # NHWC -> NCHW


def _reference_forward(x_nchw, params):
    """Pure-JAX reference (XLA conv + reduce_window) for a correctness check."""
    def conv(x, w_hwio, b):
        w_oihw = jnp.transpose(w_hwio, (3, 2, 0, 1))
        y = jax.lax.conv_general_dilated(
            x, w_oihw, window_strides=(1, 1), padding="VALID",
            dimension_numbers=("NCHW", "OIHW", "NCHW"))
        return y + b[None, :, None, None]

    def pool(x):
        return jax.lax.reduce_window(x, -jnp.inf, jax.lax.max,
                                     (1, 1, 2, 2), (1, 1, 2, 2), "VALID")

    y = pool(conv(x_nchw, params["w1"], params["b1"]))
    y = pool(conv(y, params["w2"], params["b2"]))
    return y


if __name__ == "__main__":
    key = jax.random.PRNGKey(0)
    kx, kp = jax.random.split(key)
    x = jax.random.normal(kx, (2, 1, 28, 28), jnp.float32)   # NCHW, MNIST-like
    params = init_params(kp)

    out = jax.block_until_ready(m2_stem_forward(x, params))
    assert out.shape == (2, 64, 4, 4), out.shape

    ref = jax.block_until_ready(_reference_forward(x, params))
    # conv2 runs with bf16 operands (f32 accumulation) -> slightly looser tolerance.
    assert jnp.allclose(out, ref, atol=2e-2, rtol=2e-2), \
        float(jnp.max(jnp.abs(out - ref)))

    print("KERNEL_OK")
</pallas_src>

<mosaic_0001>
module attributes {stable_mosaic.version = 11 : i64} {
  func.func @_fused_stem_kernel(%arg0: i32, %arg1: memref<1x24x24x25xf32, #tpu.memory_space<vmem>>, %arg2: memref<25x32xf32, #tpu.memory_space<vmem>>, %arg3: memref<1x1x1x32xf32, #tpu.memory_space<vmem>>, %arg4: memref<800x64xbf16, #tpu.memory_space<vmem>>, %arg5: memref<1x1x1x64xf32, #tpu.memory_space<vmem>>, %arg6: memref<1x4x4x64xf32, #tpu.memory_space<vmem>>, %arg7: memref<1x12x24x32xf32, #tpu.memory_space<vmem>>, %arg8: memref<1x4x8x64xf32, #tpu.memory_space<vmem>>) attributes {dimension_semantics = [#tpu.dimension_semantics<parallel>], iteration_bounds = array<i64: 2>, scalar_prefetch = 0 : i64, scratch_operands = 2 : i64, tpu.core_type = #tpu.core_type<tc>, window_params = [{transform_indices = @transform_0, window_bounds = array<i64: 1, 24, 24, 25>}, {pipeline_mode = #tpu.pipeline_mode<synchronous>, transform_indices = @transform_1, window_bounds = array<i64: 25, 32>}, {pipeline_mode = #tpu.pipeline_mode<synchronous>, transform_indices = @transform_2, window_bounds = array<i64: 1, 1, 1, 32>}, {pipeline_mode = #tpu.pipeline_mode<synchronous>, transform_indices = @transform_3, window_bounds = array<i64: 800, 64>}, {pipeline_mode = #tpu.pipeline_mode<synchronous>, transform_indices = @transform_4, window_bounds = array<i64: 1, 1, 1, 64>}, {transform_indices = @transform_5, window_bounds = array<i64: 1, 4, 4, 64>}]} {
    %c0 = arith.constant 0 : index
    %c0_0 = arith.constant 0 : index
    %c0_1 = arith.constant 0 : index
    %c0_2 = arith.constant 0 : index
    %0 = vector.load %arg1[%c0, %c0_0, %c0_1, %c0_2] : memref<1x24x24x25xf32, #tpu.memory_space<vmem>>, vector<1x24x24x25xf32>
    %1 = vector.shape_cast %0 : vector<1x24x24x25xf32> to vector<576x25xf32>
    %c0_3 = arith.constant 0 : index
    %c0_4 = arith.constant 0 : index
    %2 = vector.load %arg2[%c0_3, %c0_4] : memref<25x32xf32, #tpu.memory_space<vmem>>, vector<25x32xf32>
    %cst = arith.constant dense<0.000000e+00> : vector<576x32xf32>
    %3 = tpu.matmul %1, %2, %cst {dimension_numbers = #tpu.dot_dimension_numbers<[1], [0], [0], [1], [0, 0, 1, 1], [], []>} : vector<576x25xf32>, vector<25x32xf32>, vector<576x32xf32> -> vector<576x32xf32>
    %4 = vector.shape_cast %3 : vector<576x32xf32> to vector<1x24x24x32xf32>
    %5 = vector.shape_cast %4 : vector<1x24x24x32xf32> to vector<1x12x2x24x32xf32>
    %6 = vector.extract_strided_slice %5 {offsets = [0, 0, 0, 0, 0], sizes = [1, 12, 1, 24, 32], strides = [1, 1, 1, 1, 1]} : vector<1x12x2x24x32xf32> to vector<1x12x1x24x32xf32>
    %7 = vector.shape_cast %6 : vector<1x12x1x24x32xf32> to vector<1x12x24x32xf32>
    %8 = vector.extract_strided_slice %5 {offsets = [0, 0, 1, 0, 0], sizes = [1, 12, 1, 24, 32], strides = [1, 1, 1, 1, 1]} : vector<1x12x2x24x32xf32> to vector<1x12x1x24x32xf32>
    %9 = vector.shape_cast %8 : vector<1x12x1x24x32xf32> to vector<1x12x24x32xf32>
    %10 = arith.maximumf %7, %9 : vector<1x12x24x32xf32>
    %c0_5 = arith.constant 0 : index
    %c0_6 = arith.constant 0 : index
    %c0_7 = arith.constant 0 : index
    %c0_8 = arith.constant 0 : index
    %11 = vector.load %arg7[%c0_5, %c0_6, %c0_7, %c0_8] : memref<1x12x24x32xf32, #tpu.memory_space<vmem>>, vector<1x12x24x32xf32>
    tpu.vector_store %arg7[%c0_5, %c0_6, %c0_7, %c0_8], %10 {strides = array<i32>} : memref<1x12x24x32xf32, #tpu.memory_space<vmem>>, vector<1x12x24x32xf32>,
    %c0_9 = arith.constant 0 : index
    %c0_10 = arith.constant 0 : index
    %c0_11 = arith.constant 0 : index
    %c0_12 = arith.constant 0 : index
    %12 = tpu.strided_load %arg7[%c0_9, %c0_10, %c0_11, %c0_12] {strides = array<i32: 1, 1, 2, 1>} : memref<1x12x24x32xf32, #tpu.memory_space<vmem>>, vector<1x12x12x32xf32>
    %c0_13 = arith.constant 0 : index
    %c0_14 = arith.constant 0 : index
    %c1 = arith.constant 1 : index
    %c0_15 = arith.constant 0 : index
    %13 = tpu.strided_load %arg7[%c0_13, %c0_14, %c1, %c0_15] {strides = array<i32: 1, 1, 2, 1>} : memref<1x12x24x32xf32, #tpu.memory_space<vmem>>, vector<1x12x12x32xf32>
    %14 = arith.maximumf %12, %13 : vector<1x12x12x32xf32>
    %c0_16 = arith.constant 0 : index
    %c0_17 = arith.constant 0 : index
    %c0_18 = arith.constant 0 : index
    %c0_19 = arith.constant 0 : index
    %15 = vector.load %arg3[%c0_16, %c0_17, %c0_18, %c0_19] : memref<1x1x1x32xf32, #tpu.memory_space<vmem>>, vector<1x1x1x32xf32>
    %16 = vector.broadcast %15 : vector<1x1x1x32xf32> to vector<1x12x12x32xf32>
    %17 = arith.addf %14, %16 : vector<1x12x12x32xf32>
    %18 = vector.extract_strided_slice %17 {offsets = [0, 0, 0, 0], sizes = [1, 8, 8, 32], strides = [1, 1, 1, 1]} : vector<1x12x12x32xf32> to vector<1x8x8x32xf32>
    %19 = vector.extract_strided_slice %17 {offsets = [0, 0, 1, 0], sizes = [1, 8, 8, 32], strides = [1, 1, 1, 1]} : vector<1x12x12x32xf32> to vector<1x8x8x32xf32>
    %20 = vector.extract_strided_slice %17 {offsets = [0, 0, 2, 0], sizes = [1, 8, 8, 32], strides = [1, 1, 1, 1]} : vector<1x12x12x32xf32> to vector<1x8x8x32xf32>
    %21 = vector.extract_strided_slice %17 {offsets = [0, 0, 3, 0], sizes = [1, 8, 8, 32], strides = [1, 1, 1, 1]} : vector<1x12x12x32xf32> to vector<1x8x8x32xf32>
    %22 = vector.extract_strided_slice %17 {offsets = [0, 0, 4, 0], sizes = [1, 8, 8, 32], strides = [1, 1, 1, 1]} : vector<1x12x12x32xf32> to vector<1x8x8x32xf32>
    %23 = vector.extract_strided_slice %17 {offsets = [0, 1, 0, 0], sizes = [1, 8, 8, 32], strides = [1, 1, 1, 1]} : vector<1x12x12x32xf32> to vector<1x8x8x32xf32>
    %24 = vector.extract_strided_slice %17 {offsets = [0, 1, 1, 0], sizes = [1, 8, 8, 32], strides = [1, 1, 1, 1]} : vector<1x12x12x32xf32> to vector<1x8x8x32xf32>
    %25 = vector.extract_strided_slice %17 {offsets = [0, 1, 2, 0], sizes = [1, 8, 8, 32], strides = [1, 1, 1, 1]} : vector<1x12x12x32xf32> to vector<1x8x8x32xf32>
    %26 = vector.extract_strided_slice %17 {offsets = [0, 1, 3, 0], sizes = [1, 8, 8, 32], strides = [1, 1, 1, 1]} : vector<1x12x12x32xf32> to vector<1x8x8x32xf32>
    %27 = vector.extract_strided_slice %17 {offsets = [0, 1, 4, 0], sizes = [1, 8, 8, 32], strides = [1, 1, 1, 1]} : vector<1x12x12x32xf32> to vector<1x8x8x32xf32>
    %28 = vector.extract_strided_slice %17 {offsets = [0, 2, 0, 0], sizes = [1, 8, 8, 32], strides = [1, 1, 1, 1]} : vector<1x12x12x32xf32> to vector<1x8x8x32xf32>
    %29 = vector.extract_strided_slice %17 {offsets = [0, 2, 1, 0], sizes = [1, 8, 8, 32], strides = [1, 1, 1, 1]} : vector<1x12x12x32xf32> to vector<1x8x8x32xf32>
    %30 = vector.extract_strided_slice %17 {offsets = [0, 2, 2, 0], sizes = [1, 8, 8, 32], strides = [1, 1, 1, 1]} : vector<1x12x12x32xf32> to vector<1x8x8x32xf32>
    %31 = vector.extract_strided_slice %17 {offsets = [0, 2, 3, 0], sizes = [1, 8, 8, 32], strides = [1, 1, 1, 1]} : vector<1x12x12x32xf32> to vector<1x8x8x32xf32>
    %32 = vector.extract_strided_slice %17 {offsets = [0, 2, 4, 0], sizes = [1, 8, 8, 32], strides = [1, 1, 1, 1]} : vector<1x12x12x32xf32> to vector<1x8x8x32xf32>
    %33 = vector.extract_strided_slice %17 {offsets = [0, 3, 0, 0], sizes = [1, 8, 8, 32], strides = [1, 1, 1, 1]} : vector<1x12x12x32xf32> to vector<1x8x8x32xf32>
    %34 = vector.extract_strided_slice %17 {offsets = [0, 3, 1, 0], sizes = [1, 8, 8, 32], strides = [1, 1, 1, 1]} : vector<1x12x12x32xf32> to vector<1x8x8x32xf32>
    %35 = vector.extract_strided_slice %17 {offsets = [0, 3, 2, 0], sizes = [1, 8, 8, 32], strides = [1, 1, 1, 1]} : vector<1x12x12x32xf32> to vector<1x8x8x32xf32>
    %36 = vector.extract_strided_slice %17 {offsets = [0, 3, 3, 0], sizes = [1, 8, 8, 32], strides = [1, 1, 1, 1]} : vector<1x12x12x32xf32> to vector<1x8x8x32xf32>
    %37 = vector.extract_strided_slice %17 {offsets = [0, 3, 4, 0], sizes = [1, 8, 8, 32], strides = [1, 1, 1, 1]} : vector<1x12x12x32xf32> to vector<1x8x8x32xf32>
    %38 = vector.extract_strided_slice %17 {offsets = [0, 4, 0, 0], sizes = [1, 8, 8, 32], strides = [1, 1, 1, 1]} : vector<1x12x12x32xf32> to vector<1x8x8x32xf32>
    %39 = vector.extract_strided_slice %17 {offsets = [0, 4, 1, 0], sizes = [1, 8, 8, 32], strides = [1, 1, 1, 1]} : vector<1x12x12x32xf32> to vector<1x8x8x32xf32>
    %40 = vector.extract_strided_slice %17 {offsets = [0, 4, 2, 0], sizes = [1, 8, 8, 32], strides = [1, 1, 1, 1]} : vector<1x12x12x32xf32> to vector<1x8x8x32xf32>
    %41 = vector.extract_strided_slice %17 {offsets = [0, 4, 3, 0], sizes = [1, 8, 8, 32], strides = [1, 1, 1, 1]} : vector<1x12x12x32xf32> to vector<1x8x8x32xf32>
    %42 = vector.extract_strided_slice %17 {offsets = [0, 4, 4, 0], sizes = [1, 8, 8, 32], strides = [1, 1, 1, 1]} : vector<1x12x12x32xf32> to vector<1x8x8x32xf32>
    %43 = tpu.concatenate %18, %19, %20, %21, %22, %23, %24, %25, %26, %27, %28, %29, %30, %31, %32, %33 in 3 : vector<1x8x8x32xf32>, vector<1x8x8x32xf32>, vector<1x8x8x32xf32>, vector<1x8x8x32xf32>, vector<1x8x8x32xf32>, vector<1x8x8x32xf32>, vector<1x8x8x32xf32>, vector<1x8x8x32xf32>, vector<1x8x8x32xf32>, vector<1x8x8x32xf32>, vector<1x8x8x32xf32>, vector<1x8x8x32xf32>, vector<1x8x8x32xf32>, vector<1x8x8x32xf32>, vector<1x8x8x32xf32>, vector<1x8x8x32xf32> -> vector<1x8x8x512xf32>
    %44 = tpu.concatenate %34, %35, %36, %37, %38, %39, %40, %41, %42 in 3 : vector<1x8x8x32xf32>, vector<1x8x8x32xf32>, vector<1x8x8x32xf32>, vector<1x8x8x32xf32>, vector<1x8x8x32xf32>, vector<1x8x8x32xf32>, vector<1x8x8x32xf32>, vector<1x8x8x32xf32>, vector<1x8x8x32xf32> -> vector<1x8x8x288xf32>
    %45 = tpu.concatenate %43, %44 in 3 : vector<1x8x8x512xf32>, vector<1x8x8x288xf32> -> vector<1x8x8x800xf32>
    %46 = vector.shape_cast %45 : vector<1x8x8x800xf32> to vector<64x800xf32>
    %47 = arith.truncf %46 : vector<64x800xf32> to vector<64x800xbf16>
    %c0_20 = arith.constant 0 : index
    %c0_21 = arith.constant 0 : index
    %48 = vector.load %arg4[%c0_20, %c0_21] : memref<800x64xbf16, #tpu.memory_space<vmem>>, vector<800x64xbf16>
    %cst_22 = arith.constant dense<0.000000e+00> : vector<64x64xf32>
    %49 = tpu.matmul %47, %48, %cst_22 {dimension_numbers = #tpu.dot_dimension_numbers<[1], [0], [0], [1], [0, 0, 1, 1], [], []>} : vector<64x800xbf16>, vector<800x64xbf16>, vector<64x64xf32> -> vector<64x64xf32>
    %50 = vector.shape_cast %49 : vector<64x64xf32> to vector<1x8x8x64xf32>
    %51 = vector.shape_cast %50 : vector<1x8x8x64xf32> to vector<1x4x2x8x64xf32>
    %52 = vector.extract_strided_slice %51 {offsets = [0, 0, 0, 0, 0], sizes = [1, 4, 1, 8, 64], strides = [1, 1, 1, 1, 1]} : vector<1x4x2x8x64xf32> to vector<1x4x1x8x64xf32>
    %53 = vector.shape_cast %52 : vector<1x4x1x8x64xf32> to vector<1x4x8x64xf32>
    %54 = vector.extract_strided_slice %51 {offsets = [0, 0, 1, 0, 0], sizes = [1, 4, 1, 8, 64], strides = [1, 1, 1, 1, 1]} : vector<1x4x2x8x64xf32> to vector<1x4x1x8x64xf32>
    %55 = vector.shape_cast %54 : vector<1x4x1x8x64xf32> to vector<1x4x8x64xf32>
    %56 = arith.maximumf %53, %55 : vector<1x4x8x64xf32>
    %c0_23 = arith.constant 0 : index
    %c0_24 = arith.constant 0 : index
    %c0_25 = arith.constant 0 : index
    %c0_26 = arith.constant 0 : index
    %57 = vector.load %arg8[%c0_23, %c0_24, %c0_25, %c0_26] : memref<1x4x8x64xf32, #tpu.memory_space<vmem>>, vector<1x4x8x64xf32>
    tpu.vector_store %arg8[%c0_23, %c0_24, %c0_25, %c0_26], %56 {strides = array<i32>} : memref<1x4x8x64xf32, #tpu.memory_space<vmem>>, vector<1x4x8x64xf32>,
    %c0_27 = arith.constant 0 : index
    %c0_28 = arith.constant 0 : index
    %c0_29 = arith.constant 0 : index
    %c0_30 = arith.constant 0 : index
    %58 = tpu.strided_load %arg8[%c0_27, %c0_28, %c0_29, %c0_30] {strides = array<i32: 1, 1, 2, 1>} : memref<1x4x8x64xf32, #tpu.memory_space<vmem>>, vector<1x4x4x64xf32>
    %c0_31 = arith.constant 0 : index
    %c0_32 = arith.constant 0 : index
    %c1_33 = arith.constant 1 : index
    %c0_34 = arith.constant 0 : index
    %59 = tpu.strided_load %arg8[%c0_31, %c0_32, %c1_33, %c0_34] {strides = array<i32: 1, 1, 2, 1>} : memref<1x4x8x64xf32, #tpu.memory_space<vmem>>, vector<1x4x4x64xf32>
    %60 = arith.maximumf %58, %59 : vector<1x4x4x64xf32>
    %c0_35 = arith.constant 0 : index
    %c0_36 = arith.constant 0 : index
    %c0_37 = arith.constant 0 : index
    %c0_38 = arith.constant 0 : index
    %61 = vector.load %arg5[%c0_35, %c0_36, %c0_37, %c0_38] : memref<1x1x1x64xf32, #tpu.memory_space<vmem>>, vector<1x1x1x64xf32>
    %62 = vector.broadcast %61 : vector<1x1x1x64xf32> to vector<1x4x4x64xf32>
    %63 = arith.addf %60, %62 : vector<1x4x4x64xf32>
    %c0_39 = arith.constant 0 : index
    %c0_40 = arith.constant 0 : index
    %c0_41 = arith.constant 0 : index
    %c0_42 = arith.constant 0 : index
    %64 = vector.load %arg6[%c0_39, %c0_40, %c0_41, %c0_42] : memref<1x4x4x64xf32, #tpu.memory_space<vmem>>, vector<1x4x4x64xf32>
    tpu.vector_store %arg6[%c0_39, %c0_40, %c0_41, %c0_42], %63 {strides = array<i32>} : memref<1x4x4x64xf32, #tpu.memory_space<vmem>>, vector<1x4x4x64xf32>,
    return
  }
  func.func @transform_0(%arg0: i32) -> (i32, i32, i32, i32) {
    %c0_i32 = arith.constant 0 : i32
    %c0_i32_0 = arith.constant 0 : i32
    %c0_i32_1 = arith.constant 0 : i32
    %c0_i32_2 = arith.constant 0 : i32
    return %arg0, %c0_i32, %c0_i32_0, %c0_i32_1 : i32, i32, i32, i32
  }
  func.func @transform_1(%arg0: i32) -> (i32, i32) {
    %c0_i32 = arith.constant 0 : i32
    %c0_i32_0 = arith.constant 0 : i32
    %c0_i32_1 = arith.constant 0 : i32
    return %c0_i32, %c0_i32_0 : i32, i32
  }
  func.func @transform_2(%arg0: i32) -> (i32, i32, i32, i32) {
    %c0_i32 = arith.constant 0 : i32
    %c0_i32_0 = arith.constant 0 : i32
    %c0_i32_1 = arith.constant 0 : i32
    %c0_i32_2 = arith.constant 0 : i32
    %c0_i32_3 = arith.constant 0 : i32
    return %c0_i32, %c0_i32_0, %c0_i32_1, %c0_i32_2 : i32, i32, i32, i32
  }
  func.func @transform_3(%arg0: i32) -> (i32, i32) {
    %c0_i32 = arith.constant 0 : i32
    %c0_i32_0 = arith.constant 0 : i32
    %c0_i32_1 = arith.constant 0 : i32
    return %c0_i32, %c0_i32_0 : i32, i32
  }
  func.func @transform_4(%arg0: i32) -> (i32, i32, i32, i32) {
    %c0_i32 = arith.constant 0 : i32
    %c0_i32_0 = arith.constant 0 : i32
    %c0_i32_1 = arith.constant 0 : i32
    %c0_i32_2 = arith.constant 0 : i32
    %c0_i32_3 = arith.constant 0 : i32
    return %c0_i32, %c0_i32_0, %c0_i32_1, %c0_i32_2 : i32, i32, i32, i32
  }
  func.func @transform_5(%arg0: i32) -> (i32, i32, i32, i32) {
    %c0_i32 = arith.constant 0 : i32
    %c0_i32_0 = arith.constant 0 : i32
    %c0_i32_1 = arith.constant 0 : i32
    %c0_i32_2 = arith.constant 0 : i32
    return %arg0, %c0_i32, %c0_i32_0, %c0_i32_1 : i32, i32, i32, i32
  }
}

</mosaic_0001>

<bundles_post_ra>
// kernel: m2_stem_forward.1
= control target key start
LH: loop header
LB: loop body
LE: loop exit
PB: predicated region body
PF: predicated region fallthrough
CT: control target
= control target key end

     0   :  { %10 = vsyncpa [#allocation5], 0  ;;  %s5630_s0 = inlined_call_operand.vmem [shape: f32[2,24,24,25], index: 0, kind: input, shape index: {}]   ;;  %s5631_s1 = inlined_call_operand.vmem [shape: f32[25,32], index: 1, kind: input, shape index: {}]   ;;  %s5632_s2 = inlined_call_operand.vmem [shape: f32[1,1,1,32], index: 2, kind: input, shape index: {}]   ;;  %s5633_s3 = inlined_call_operand.vmem [shape: bf16[800,64], index: 3, kind: input, shape index: {}]   ;;  %s5634_s4 = inlined_call_operand.vmem [shape: f32[1,1,1,64], index: 4, kind: input, shape index: {}]   ;;  %s5635_s5 = inlined_call_operand.hbm [shape: f32[2,4,4,64], index: 5, kind: output, shape index: {}]  }
   0x1   :  { %12 = vsyncpa [#allocation5 + $0x1], 0  ;;  %s4068_s18 = smov 0   ;;  %s4070_s19 = smov 0  }
   0x2   :  { %s4072_s20 = smov 0   ;;  %s4074_s21 = smov 0  }
   0x3 LB: > { %s4089_s22 = sadd.s32 4294967295, %s4030_s21   ;;  %s2987_s23 = sadd.s32 4294967294, %s4030_s21   ;;  %s4030_s21 = sphi %s4074_s21, %s5717_s21   ;;  %s4026_s20 = sphi %s4072_s20, %s5716_s20   ;;  %s4022_s19 = sphi %s4070_s19, %s5715_s19   ;;  %s4018_s18 = sphi %s4068_s18, %s5714_s18  }
   0x4   : > { %s4093_s24 = sadd.s32 1, %s4030_s21   ;;  %s135_s25 = sadd.s32 1, %s4026_s20 }
   0x5   : > { %s132_s26 = ssub.s32 %s4030_s21, %s4093_s24  ;;  %p145_p0 = scmp.ne.s32.totalorder %s4026_s20, %s4022_s19 }
   0x6   : > { %p133_p1 = scmp.eq.s32.totalorder %s132_s26, 0  ;;  %p146_p2 = scmp.eq.s32.totalorder %s4089_s22, 1 }
   0x7   : > { %p151_p3 = scmp.ne.s32.totalorder %s4022_s19, %s4018_s18  ;;  %p152_p4 = scmp.eq.s32.totalorder %s2987_s23, 1 }
   0x8   : > { %s4104_s27 = scalar_select %p133_p1, %s4026_s20, %s135_s25  }
   0x9   : > { %p4106_p5 = por %p146_p2, %p145_p0  ;;  %p4110_p6 = por %p152_p4, %p151_p3 }
   0xa   : > { %p2990_p7 = scmp.ge.s32.totalorder %s4030_s21, 1  ;;  %p190_p8 = scmp.lt.s32.totalorder %s4030_s21, 3 }
   0xc   : > { %p191_p9 = pnand %p2990_p7, %p190_p8 }
   0xe   : > { %194 = sbr.rel (%p191_p9) target bundleno = 844 (0x34c), region = 40 }
  0x15   : > { %v296_v0 = vld [vmem:[%s5631_s1] sm:$0xff]  ;;  %v297_v1 = vld [vmem:[%s5631_s1 + $0x8] sm:$0xff]  ;;  %v298_v2 = vld [vmem:[%s5631_s1 + $0x10] sm:$0xff]  ;;  %vm517_vm0 = vcmask 1040384   ;;  %p218_p10 = scmp.lt.s32.totalorder %s4089_s22, 1  ;;  %vm4032_vm1 = vmmov 1  }
  0x16   : > { %v3458_v3 = vpack.c.bf16 %v297_v1, %v296_v0  ;;  %v299_v4 = vld [vmem:[%s5631_s1 + $0x18] sm:$0x1]  ;;  %vm3463_vm2 = vmpackc.low %vm517_vm0, %vm4032_vm1  ;;  %vm300_vm3 = vcmask 203776   ;;  %vm982_vm4 = vcmask 261120   ;;  %vm1234_vm5 = vcmask 1045504   ;;  %s4033_s16 = smov 64  }
  0x17   : > { %v3462_v5 = vpack.c.bf16 %v299_v4, %v298_v2  ;;  %s219_s13 = scalar_select %p218_p10, %s4089_s22, 1  ;;  %vm1185_vm6 = vcmask 1046528   ;;  %vm1283_vm7 = vcmask 1044480   ;;  %vm1332_vm8 = vcmask 1043456  }
  0x18   : > { %3459 = vmatprep.subr.bf16.mxu0 %v3458_v3  ;;  %s4035_s26 = smov 96   ;;  %vm1634_vm9 = vcmask 523264   ;;  %vm1643_vm10 = vcmask 785408   ;;  %s215_s25 = sand.u32 1, %s4022_s19   ;;  %vm2906_vm11 = vcmask 519168  }
  0x19   : > { %3461 = vmatpush3.bf16.msra.mxu0 %v3458_v3  ;;  %s3468_s14 = smul.u32 576, %s219_s13  ;;  %s2991_s30 = sshll.u32 %s215_s25, 4 }
  0x1a   : > { %3464 = vmatprep.subr.msk.bf16.mxu0 %vm3463_vm2, %v3462_v5  ;;  %s217_s8 = scalar_lea.vmem [#allocation4], %s2991_s30  ;;  %s3127_s9 = sshll.u32 %s4089_s22, 8 }
  0x1b   : > { %s4133_s17 = scalar_lea.vmem %s5630_s0, %s3468_s14  ;;  %s2925_s10 = sshll.u32 %s217_s8, 4  ;;  %s5581_s10 = int_to_ptr.vmem [resolvable:$true] %s2925_s10 }
  0x1c   : > { %v224_v6 = vld [vmem:[%s4133_s17] sm:$0xff]  ;;  %v225_v7 = vld [vmem:[%s4133_s17 + $0x8] sm:$0xff]  ;;  %v226_v8 = vld [vmem:[%s4133_s17 + $0x10] sm:$0xff]  ;;  %s5579_s13 = scalar_lea.hbm %s5635_s5, %s3127_s9  ;;  %s5587_s22 = scalar_lea.sflag [#allocation5], %s215_s25 }
  0x1d   : > { %3467 = vmatpush3.bf16.msk.msra.mxu0 %vm3463_vm2, %v3462_v5  ;;  %3338 = vmatprep.mubr.msk.f32.mxu0 %vm300_vm3, %v224_v6  ;;  %v227_v9 = vld [vmem:[%s4133_s17 + $0x18] sm:$0xff]  ;;  %v228_v10 = vld [vmem:[%s4133_s17 + $0x20] sm:$0xff]  ;;  %v229_v11 = vld [vmem:[%s4133_s17 + $0x28] sm:$0xff]  ;;  %s3968_s14 = scalar_lea.vmem %s5581_s10, 256 }
  0x1e   : > { %v230_v12 = vld [vmem:[%s4133_s17 + $0x30] sm:$0xff]  ;;  %v231_v13 = vld [vmem:[%s4133_s17 + $0x38] sm:$0xff]  ;;  %v232_v14 = vld [vmem:[%s4133_s17 + $0x40] sm:$0xff]  ;;  %p3969_p11 = scmp.ne.s32.totalorder %s5581_s10, %s3968_s14 }
  0x1f   : > { %v233_v15 = vld [vmem:[%s4133_s17 + $0x48] sm:$0xff]  ;;  %v234_v16 = vld [vmem:[%s4133_s17 + $0x50] sm:$0xff]  ;;  %v235_v17 = vld [vmem:[%s4133_s17 + $0x58] sm:$0xff] }
  0x20   : > { %3339 = vmatmul.mubr.msk.f32.vlgmr.msra.gmra.mrb[0].mxu0 %vm300_vm3, %v225_v7  ;;  %v236_v18 = vld [vmem:[%s4133_s17 + $0x60] sm:$0xff]  ;;  %v237_v19 = vld [vmem:[%s4133_s17 + $0x68] sm:$0xff]  ;;  %v238_v20 = vld [vmem:[%s4133_s17 + $0x70] sm:$0xff]  ;;  %p3970_p12 = pnand %p3969_p11, %p4106_p5 }
  0x21   : > { %3341 = vmatprep.mubr.msk.f32.mxu0 %vm300_vm3, %v226_v8  ;;  %v239_v21 = vld [vmem:[%s4133_s17 + $0x78] sm:$0xff]  ;;  %v240_v22 = vld [vmem:[%s4133_s17 + $0x80] sm:$0xff]  ;;  %v241_v23 = vld [vmem:[%s4133_s17 + $0x88] sm:$0xff] }
  0x22   : > { %v242_v24 = vld [vmem:[%s4133_s17 + $0x90] sm:$0xff]  ;;  %v243_v25 = vld [vmem:[%s4133_s17 + $0x98] sm:$0xff]  ;;  %v244_v26 = vld [vmem:[%s4133_s17 + $0xa0] sm:$0xff]  ;;  %p3971_p13 = pneg %p3970_p12 }
  0x23   : > { %v245_v27 = vld [vmem:[%s4133_s17 + $0xa8] sm:$0xff]  ;;  %v246_v28 = vld [vmem:[%s4133_s17 + $0xb0] sm:$0xff]  ;;  %v247_v29 = vld [vmem:[%s4133_s17 + $0xb8] sm:$0xff] }
  0x24   : > { %3342 = vmatmul.mubr.msk.f32.gmra.mrb[2].mxu0 %vm300_vm3, %v227_v9  ;;  %v248_v30 = vld [vmem:[%s4133_s17 + $0xc0] sm:$0xff]  ;;  %v249_v31 = vld [vmem:[%s4133_s17 + $0xc8] sm:$0xff]  ;;  %v250_v32 = vld [vmem:[%s4133_s17 + $0xd0] sm:$0xff] }
  0x25   : > { %3344 = vmatprep.mubr.msk.f32.mxu0 %vm300_vm3, %v228_v10  ;;  %v251_v33 = vld [vmem:[%s4133_s17 + $0xd8] sm:$0xff]  ;;  %v252_v34 = vld [vmem:[%s4133_s17 + $0xe0] sm:$0xff]  ;;  %v253_v35 = vld [vmem:[%s4133_s17 + $0xe8] sm:$0xff] }
  0x26   : > { %v254_v36 = vld [vmem:[%s4133_s17 + $0xf0] sm:$0xff]  ;;  %v255_v37 = vld [vmem:[%s4133_s17 + $0xf8] sm:$0xff]  ;;  %v256_v38 = vld [vmem:[%s4133_s17 + $0x100] sm:$0xff] }
  0x27   : > { %v257_v39 = vld [vmem:[%s4133_s17 + $0x108] sm:$0xff]  ;;  %v258_v40 = vld [vmem:[%s4133_s17 + $0x110] sm:$0xff]  ;;  %v259_v41 = vld [vmem:[%s4133_s17 + $0x118] sm:$0xff] }
  0x28   : > { %3345 = vmatmul.mubr.msk.f32.gmra.mrb[4].mxu0 %vm300_vm3, %v229_v11  ;;  %v260_v42 = vld [vmem:[%s4133_s17 + $0x120] sm:$0xff]  ;;  %v261_v43 = vld [vmem:[%s4133_s17 + $0x128] sm:$0xff]  ;;  %v262_v44 = vld [vmem:[%s4133_s17 + $0x130] sm:$0xff] }
  0x29   : > { %3347 = vmatprep.mubr.msk.f32.mxu0 %vm300_vm3, %v230_v12  ;;  %v263_v45 = vld [vmem:[%s4133_s17 + $0x138] sm:$0xff]  ;;  %v264_v46 = vld [vmem:[%s4133_s17 + $0x140] sm:$0xff]  ;;  %v265_v47 = vld [vmem:[%s4133_s17 + $0x148] sm:$0xff] }
  0x2a   : > { %v266_v48 = vld [vmem:[%s4133_s17 + $0x150] sm:$0xff]  ;;  %v267_v49 = vld [vmem:[%s4133_s17 + $0x158] sm:$0xff]  ;;  %v268_v50 = vld [vmem:[%s4133_s17 + $0x160] sm:$0xff] }
  0x2b   : > { %v269_v51 = vld [vmem:[%s4133_s17 + $0x168] sm:$0xff]  ;;  %v270_v52 = vld [vmem:[%s4133_s17 + $0x170] sm:$0xff]  ;;  %v271_v53 = vld [vmem:[%s4133_s17 + $0x178] sm:$0xff] }
  0x2c   : > { %3348 = vmatmul.mubr.msk.f32.gmra.mrb[6].mxu0 %vm300_vm3, %v231_v13  ;;  %v272_v54 = vld [vmem:[%s4133_s17 + $0x180] sm:$0xff]  ;;  %v273_v55 = vld [vmem:[%s4133_s17 + $0x188] sm:$0xff]  ;;  %v274_v56 = vld [vmem:[%s4133_s17 + $0x190] sm:$0xff] }
  0x2d   : > { %3350 = vmatprep.mubr.msk.f32.mxu0 %vm300_vm3, %v232_v14  ;;  %v275_v57 = vld [vmem:[%s4133_s17 + $0x198] sm:$0xff]  ;;  %v276_v58 = vld [vmem:[%s4133_s17 + $0x1a0] sm:$0xff]  ;;  %v277_v59 = vld [vmem:[%s4133_s17 + $0x1a8] sm:$0xff] }
  0x2e   : > { %v278_v60 = vld [vmem:[%s4133_s17 + $0x1b0] sm:$0xff]  ;;  %v279_v61 = vld [vmem:[%s4133_s17 + $0x1b8] sm:$0xff]  ;;  %v280_v62 = vld [vmem:[%s4133_s17 + $0x1c0] sm:$0xff] }
  0x2f   : > { %v281_v63 = vld [vmem:[%s4133_s17 + $0x1c8] sm:$0xff]  ;;  %v282_v0 = vld [vmem:[%s4133_s17 + $0x1d0] sm:$0xff]  ;;  %v283_v1 = vld [vmem:[%s4133_s17 + $0x1d8] sm:$0xff] }
  0x30   : > { %3351 = vmatmul.mubr.msk.f32.gmra.mrb[8].mxu0 %vm300_vm3, %v233_v15  ;;  %v284_v2 = vld [vmem:[%s4133_s17 + $0x1e0] sm:$0xff]  ;;  %v285_v3 = vld [vmem:[%s4133_s17 + $0x1e8] sm:$0xff]  ;;  %v286_v4 = vld [vmem:[%s4133_s17 + $0x1f0] sm:$0xff] }
  0x31   : > { %3353 = vmatprep.mubr.msk.f32.mxu0 %vm300_vm3, %v234_v16  ;;  %v287_v5 = vld [vmem:[%s4133_s17 + $0x1f8] sm:$0xff]  ;;  %v288_v6 = vld [vmem:[%s4133_s17 + $0x200] sm:$0xff]  ;;  %v289_v7 = vld [vmem:[%s4133_s17 + $0x208] sm:$0xff] }
  0x32   : > { %v290_v8 = vld [vmem:[%s4133_s17 + $0x210] sm:$0xff]  ;;  %v291_v9 = vld [vmem:[%s4133_s17 + $0x218] sm:$0xff]  ;;  %v292_v10 = vld [vmem:[%s4133_s17 + $0x220] sm:$0xff] }
  0x33   : > { %v293_v11 = vld [vmem:[%s4133_s17 + $0x228] sm:$0xff]  ;;  %v294_v12 = vld [vmem:[%s4133_s17 + $0x230] sm:$0xff]  ;;  %v295_v13 = vld [vmem:[%s4133_s17 + $0x238] sm:$0xff]  ;;  %s4034_s17 = smov 32  }
  0x34   : > { %3354 = vmatmul.mubr.msk.f32.gmra.mrb[10].mxu0 %vm300_vm3, %v235_v17 }
  0x35   : > { %3356 = vmatprep.mubr.msk.f32.mxu0 %vm300_vm3, %v236_v18 }
  0x38   : > { %3357 = vmatmul.mubr.msk.f32.gmra.mrb[12].mxu0 %vm300_vm3, %v237_v19 }
  0x39   : > { %3359 = vmatprep.mubr.msk.f32.mxu0 %vm300_vm3, %v238_v20 }
  0x3c   : > { %3360 = vmatmul.mubr.msk.f32.gmra.mrb[14].mxu0 %vm300_vm3, %v239_v21 }
  0x3d   : > { %3362 = vmatprep.mubr.msk.f32.mxu0 %vm300_vm3, %v240_v22 }
  0x40   : > { %3363 = vmatmul.mubr.msk.f32.gmra.mrb[16].mxu0 %vm300_vm3, %v241_v23 }
  0x41   : > { %3365 = vmatprep.mubr.msk.f32.mxu0 %vm300_vm3, %v242_v24 }
  0x44   : > { %3366 = vmatmul.mubr.msk.f32.gmra.mrb[18].mxu0 %vm300_vm3, %v243_v25  ;;  %v3918_v25 = vld [vmem:[%s5633_s3 + $0x40] sm:$0xff]  }
  0x45   : > { %3368 = vmatprep.mubr.msk.f32.mxu0 %vm300_vm3, %v244_v26  ;;  %v3919_v26 = vld [vmem:[%s5633_s3] sm:$0xff]   ;;  %3204 = vmatprep.subr.bf16.mxu1 %v3918_v25 }
  0x46   : > { %3205 = vmatpush3.bf16.msra.mxu1 %v3919_v26 }
  0x48   : > { %3369 = vmatmul.mubr.msk.f32.gmra.mrb[20].mxu0 %vm300_vm3, %v245_v27 }
  0x49   : > { %3371 = vmatprep.mubr.msk.f32.mxu0 %vm300_vm3, %v246_v28 }
  0x4c   : > { %3372 = vmatmul.mubr.msk.f32.gmra.mrb[22].mxu0 %vm300_vm3, %v247_v29 }
  0x4d   : > { %3374 = vmatprep.mubr.msk.f32.mxu0 %vm300_vm3, %v248_v30  ;;  %v3920_v30 = vld [vmem:[%s5633_s3 + $0x48] sm:$0xff]  }
  0x4e   : > { %3206 = vmatprep.subr.bf16.mxu1 %v3920_v30 }
  0x50   : > { %3375 = vmatmul.mubr.msk.f32.gmra.mrb[24].mxu0 %vm300_vm3, %v249_v31 }
  0x51   : > { %3377 = vmatprep.mubr.msk.f32.mxu0 %vm300_vm3, %v250_v32  ;;  %v3921_v32 = vld [vmem:[%s5633_s3 + $0x8] sm:$0xff]  }
  0x52   : > { %3207 = vmatpush3.bf16.msra.mxu1 %v3921_v32 }
  0x54   : > { %3378 = vmatmul.mubr.msk.f32.gmra.mrb[26].mxu0 %vm300_vm3, %v251_v33 }
  0x55   : > { %3380 = vmatprep.mubr.msk.f32.mxu0 %vm300_vm3, %v252_v34 }
  0x58   : > { %3381 = vmatmul.mubr.msk.f32.gmra.mrb[28].mxu0 %vm300_vm3, %v253_v35 }
  0x59   : > { %3383 = vmatprep.mubr.msk.f32.mxu0 %vm300_vm3, %v254_v36 }
  0x5c   : > { %3384 = vmatmul.mubr.msk.f32.gmra.mrb[30].mxu0 %vm300_vm3, %v255_v37 }
  0x5d   : > { %3386 = vmatprep.mubr.msk.f32.mxu0 %vm300_vm3, %v256_v38  ;;  %v3922_v38 = vld [vmem:[%s5633_s3 + $0x50] sm:$0xff]  }
  0x5e   : > { %3208 = vmatprep.subr.bf16.mxu1 %v3922_v38 }
  0x60   : > { %3387 = vmatmul.mubr.msk.f32.gmra.mrb[32].mxu0 %vm300_vm3, %v257_v39  ;;  %v3923_v39 = vld [vmem:[%s5633_s3 + $0x10] sm:$0xff]  }
  0x61   : > { %3389 = vmatprep.mubr.msk.f32.mxu0 %vm300_vm3, %v258_v40  ;;  %3209 = vmatpush3.bf16.msra.mxu1 %v3923_v39  ;;  %v3932_v39 = vld [vmem:[%s5633_s3 + $0x78] sm:$0xff]  }
  0x64   : > { %3390 = vmatmul.mubr.msk.f32.gmra.mrb[34].mxu0 %vm300_vm3, %v259_v41 }
  0x65   : > { %3392 = vmatprep.mubr.msk.f32.mxu0 %vm300_vm3, %v260_v42 }
  0x68   : > { %3393 = vmatmul.mubr.msk.f32.gmra.mrb[36].mxu0 %vm300_vm3, %v261_v43 }
  0x69   : > { %3395 = vmatprep.mubr.msk.f32.mxu0 %vm300_vm3, %v262_v44 }
  0x6c   : > { %3396 = vmatmul.mubr.msk.f32.gmra.mrb[38].mxu0 %vm300_vm3, %v263_v45 }
  0x6d   : > { %3398 = vmatprep.mubr.msk.f32.mxu0 %vm300_vm3, %v264_v46  ;;  %v4306_v46 = vld [vmem:[%s5632_s2] ss:$0 sm:$0xff] }
  0x70   : > { %3399 = vmatmul.mubr.msk.f32.gmra.mrb[40].mxu0 %vm300_vm3, %v265_v47  ;;  %v3924_v47 = vld [vmem:[%s5633_s3 + $0x58] sm:$0xff]  }
  0x71   : > { %3401 = vmatprep.mubr.msk.f32.mxu0 %vm300_vm3, %v266_v48  ;;  %3210 = vmatprep.subr.bf16.mxu1 %v3924_v47 }
  0x74   : > { %3402 = vmatmul.mubr.msk.f32.gmra.mrb[42].mxu0 %vm300_vm3, %v267_v49 }
  0x75   : > { %3404 = vmatprep.mubr.msk.f32.mxu0 %vm300_vm3, %v268_v50 }
  0x78   : > { %3405 = vmatmul.mubr.msk.f32.gmra.mrb[44].mxu0 %vm300_vm3, %v269_v51 }
  0x79   : > { %3407 = vmatprep.mubr.msk.f32.mxu0 %vm300_vm3, %v270_v52  ;;  %v3925_v52 = vld [vmem:[%s5633_s3 + $0x18] sm:$0xff]  }
  0x7a   : > { %3211 = vmatpush3.bf16.msra.mxu1 %v3925_v52 }
  0x7c   : > { %3408 = vmatmul.mubr.msk.f32.gmra.mrb[46].mxu0 %vm300_vm3, %v271_v53 }
  0x7d   : > { %3410 = vmatprep.mubr.msk.f32.mxu0 %vm300_vm3, %v272_v54 }
  0x80   : > { %3411 = vmatmul.mubr.msk.f32.gmra.mrb[48].mxu0 %vm300_vm3, %v273_v55 }
  0x81   : > { %3413 = vmatprep.mubr.msk.f32.mxu0 %vm300_vm3, %v274_v56 }
  0x84   : > { %3414 = vmatmul.mubr.msk.f32.gmra.mrb[50].mxu0 %vm300_vm3, %v275_v57 }
  0x85   : > { %3416 = vmatprep.mubr.msk.f32.mxu0 %vm300_vm3, %v276_v58 }
  0x88   : > { %3417 = vmatmul.mubr.msk.f32.gmra.mrb[52].mxu0 %vm300_vm3, %v277_v59  ;;  %v3926_v59 = vld [vmem:[%s5633_s3 + $0x60] sm:$0xff]  }
  0x89   : > { %3419 = vmatprep.mubr.msk.f32.mxu0 %vm300_vm3, %v278_v60  ;;  %3212 = vmatprep.subr.bf16.mxu1 %v3926_v59 }
  0x8c   : > { %3420 = vmatmul.mubr.msk.f32.gmra.mrb[54].mxu0 %vm300_vm3, %v279_v61 }
  0x8d   : > { %3422 = vmatprep.mubr.msk.f32.mxu0 %vm300_vm3, %v280_v62  ;;  %v3927_v62 = vld [vmem:[%s5633_s3 + $0x20] sm:$0xff]  }
  0x8e   : > { %3213 = vmatpush3.bf16.msra.mxu1 %v3927_v62 }
  0x90   : > { %3423 = vmatmul.mubr.msk.f32.gmra.mrb[56].mxu0 %vm300_vm3, %v281_v63 }
  0x91   : > { %3425 = vmatprep.mubr.msk.f32.mxu0 %vm300_vm3, %v282_v0 }
  0x94   : > { %3426 = vmatmul.mubr.msk.f32.gmra.mrb[58].mxu0 %vm300_vm3, %v283_v1 }
  0x95   : > { %3428 = vmatprep.mubr.msk.f32.mxu0 %vm300_vm3, %v284_v2 }
  0x98   : > { %3429 = vmatmul.mubr.msk.f32.gmra.mrb[60].mxu0 %vm300_vm3, %v285_v3 }
  0x99   : > { %3431 = vmatprep.mubr.msk.f32.mxu0 %vm300_vm3, %v286_v4 }
  0x9c   : > { %3432 = vmatmul.mubr.msk.f32.gmra.mrb[62].mxu0 %vm300_vm3, %v287_v5 }
  0x9d   : > { %3434 = vmatprep.mubr.msk.f32.mxu0 %vm300_vm3, %v288_v6 }
  0xa0   : > { %3435 = vmatmul.mubr.msk.f32.gmra.mrb[64].mxu0 %vm300_vm3, %v289_v7 }
  0xa1   : > { %3437 = vmatprep.mubr.msk.f32.mxu0 %vm300_vm3, %v290_v8  ;;  %v3928_v8 = vld [vmem:[%s5633_s3 + $0x68] sm:$0xff]  }
  0xa2   : > { %3214 = vmatprep.subr.bf16.mxu1 %v3928_v8 }
  0xa4   : > { %3438 = vmatmul.mubr.msk.f32.gmra.mrb[66].mxu0 %vm300_vm3, %v291_v9 }
  0xa5   : > { %3440 = vmatprep.mubr.msk.f32.mxu0 %vm300_vm3, %v292_v10 }
  0xa8   : > { %3441 = vmatmul.mubr.msk.f32.gmra.mrb[68].mxu0 %vm300_vm3, %v293_v11  ;;  %v3929_v11 = vld [vmem:[%s5633_s3 + $0x28] sm:$0xff]  }
  0xa9   : > { %3443 = vmatprep.mubr.msk.f32.mxu0 %vm300_vm3, %v294_v12  ;;  %3215 = vmatpush3.bf16.msra.mxu1 %v3929_v11 }
  0xac   : > { %3444 = vmatmul.mubr.msk.f32.gmra.mrb[70].mxu0 %vm300_vm3, %v295_v13 }
  0xf3   : > { %v3340_v14 = vpop.f32.mrb[0].mxu0 }
  0xf4   : > { %v587_v15 = vpop.f32.mrb[1].mxu0 }
  0xf7   : > { %v3343_v16 = vpop.f32.mrb[2].mxu0 }
  0xf8   : > { %v946_v17 = vmax.f32 %v587_v15, %v3343_v16  ;;  %v597_v18 = vpop.f32.mrb[3].mxu0 }
  0xfa   : > { %983 = vst.msk [vmem:[#allocation2] sm:$0xff] %vm982_vm4, %v946_v17 }
  0xfb   : > { %v3346_v19 = vpop.f32.mrb[4].mxu0 }
  0xfc   : > { %v948_v20 = vmax.f32 %v597_v18, %v3346_v19  ;;  %v607_v21 = vpop.f32.mrb[5].mxu0 }
  0xfd   : > { %v947_v22 = vmax.f32 %v3340_v14, %v607_v21 }
  0xfe   : > { %985 = vst.msk [vmem:[#allocation2 + $0x10] sm:$0xff] %vm982_vm4, %v948_v20 }
  0xff   : > { %984 = vst.msk [vmem:[#allocation2 + $0x8] sm:$0xff] %vm982_vm4, %v947_v22  ;;  %v3349_v23 = vpop.f32.mrb[6].mxu0 }
 0x100   : > { %v617_v24 = vpop.f32.mrb[7].mxu0 }
 0x103   : > { %v3352_v27 = vpop.f32.mrb[8].mxu0 }
 0x104   : > { %v949_v28 = vmax.f32 %v617_v24, %v3352_v27  ;;  %v627_v29 = vpop.f32.mrb[9].mxu0  ;;  %v3930_v24 = vld [vmem:[%s5633_s3 + $0x70] sm:$0xff]  }
 0x105   : > { %v1021_v35 = vld [vmem:[#allocation2 + $0x10] ss:$2 sm:$0xf]  ;;  %v1069_v37 = vld [vmem:[#allocation2 + $0x11] ss:$2 sm:$0xf]  ;;  %3216 = vmatprep.subr.bf16.mxu1 %v3930_v24 }
 0x106   : > { %986 = vst.msk [vmem:[#allocation2 + $0x18] sm:$0xff] %vm982_vm4, %v949_v28  ;;  %v1019_v40 = vld [vmem:[#allocation2] ss:$2 sm:$0xff]  ;;  %v1067_v41 = vld [vmem:[#allocation2 + $0x1] ss:$2 sm:$0xff]  ;;  %v1115_v44 = vmax.f32 %v1021_v35, %v1069_v37 }
 0x107   : > { %v3355_v31 = vpop.f32.mrb[10].mxu0  ;;  %v1114_v45 = vmax.f32 %v1019_v40, %v1067_v41 }
 0x108   : > { %v951_v33 = vmax.f32 %v627_v29, %v3355_v31  ;;  %v637_v34 = vpop.f32.mrb[11].mxu0  ;;  %v4312_v51 = vadd.f32 %v4306_v46, %v1115_v44  ;;  %v3931_v29 = vld [vmem:[%s5633_s3 + $0x30] sm:$0xff]  }
 0x109   : > { %v950_v36 = vmax.f32 %v3349_v23, %v637_v34  ;;  %v4318_v55 = vadd.f32 %v4306_v46, %v1114_v45  ;;  %3217 = vmatpush3.bf16.msra.mxu1 %v3931_v29  ;;  %v3933_v45 = vld [vmem:[%s5633_s3 + $0x38] sm:$0xff]  }
 0x10a   : > { %988 = vst.msk [vmem:[#allocation2 + $0x28] sm:$0xff] %vm982_vm4, %v951_v33  ;;  %v1236_v2 = vrot.slane %v4312_v51, 2  ;;  %v1187_v3 = vrot.slane %v4312_v51, 1  ;;  %v1285_v19 = vrot.slane %v4312_v51, 3  ;;  %3218 = vmatprep.subr.bf16.mxu1 %v3932_v39 }
 0x10b   : > { %987 = vst.msk [vmem:[#allocation2 + $0x20] sm:$0xff] %vm982_vm4, %v950_v36  ;;  %v3358_v42 = vpop.f32.mrb[12].mxu0  ;;  %v1235_v6 = vrot.slane %v4318_v55, 2  ;;  %v1186_v7 = vrot.slane %v4318_v55, 1  ;;  %v1284_v18 = vrot.slane %v4318_v55, 3 }
 0x10c   : > { %v647_v43 = vpop.f32.mrb[13].mxu0 }
 0x10d   : > { %v1237_v20 = vsel %vm1234_vm5, %v1235_v6, %v1236_v2  ;;  %v1188_v22 = vsel %vm1185_vm6, %v1186_v7, %v1187_v3  ;;  %v1286_v34 = vsel %vm1283_vm7, %v1284_v18, %v1285_v19  ;;  %3219 = vmatpush3.bf16.msra.mxu1 %v3933_v45 }
 0x10f   : > { %v3361_v48 = vpop.f32.mrb[14].mxu0 }
 0x110   : > { %v952_v49 = vmax.f32 %v647_v43, %v3361_v48  ;;  %v657_v50 = vpop.f32.mrb[15].mxu0 }
 0x111   : > { %v1025_v53 = vld [vmem:[#allocation2 + $0x28] ss:$2 sm:$0xf]  ;;  %v1073_v54 = vld [vmem:[#allocation2 + $0x29] ss:$2 sm:$0xf] }
 0x112   : > { %989 = vst.msk [vmem:[#allocation2 + $0x30] sm:$0xff] %vm982_vm4, %v952_v49  ;;  %v1023_v56 = vld [vmem:[#allocation2 + $0x18] ss:$2 sm:$0xff]  ;;  %v1071_v57 = vld [vmem:[#allocation2 + $0x19] ss:$2 sm:$0xff]  ;;  %v1117_v58 = vmax.f32 %v1025_v53, %v1073_v54 }
 0x113   : > { %v3364_v60 = vpop.f32.mrb[16].mxu0  ;;  %v1116_v61 = vmax.f32 %v1023_v56, %v1071_v57 }
 0x114   : > { %v954_v63 = vmax.f32 %v657_v50, %v3364_v60  ;;  %v667_v0 = vpop.f32.mrb[17].mxu0  ;;  %v4328_v1 = vadd.f32 %v4306_v46, %v1117_v58 }
 0x115   : > { %v953_v4 = vmax.f32 %v3358_v42, %v667_v0  ;;  %v4333_v5 = vadd.f32 %v4306_v46, %v1116_v61 }
 0x116   : > { %991 = vst.msk [vmem:[#allocation2 + $0x40] sm:$0xff] %vm982_vm4, %v954_v63  ;;  %v1239_v9 = vrot.slane %v4328_v1, 2  ;;  %v1190_v10 = vrot.slane %v4328_v1, 1  ;;  %v1288_v16 = vrot.slane %v4328_v1, 3  ;;  %v1337_v63 = vrot.slane %v4328_v1, 4 }
 0x117   : > { %990 = vst.msk [vmem:[#allocation2 + $0x38] sm:$0xff] %vm982_vm4, %v953_v4  ;;  %v3367_v12 = vpop.f32.mrb[18].mxu0  ;;  %v1238_v13 = vrot.slane %v4333_v5, 2  ;;  %v1189_v14 = vrot.slane %v4333_v5, 1  ;;  %v1287_v15 = vrot.slane %v4333_v5, 3  ;;  %v1336_v62 = vrot.slane %v4333_v5, 4 }
 0x118   : > { %v677_v17 = vpop.f32.mrb[19].mxu0 }
 0x119   : > { %v4355_v21 = vsel %vm1234_vm5, %v1238_v13, %v1239_v9  ;;  %v1191_v23 = vsel %vm1185_vm6, %v1189_v14, %v1190_v10  ;;  %v4364_v28 = vsel %vm1283_vm7, %v1287_v15, %v1288_v16  ;;  %v4412_v8 = vsel %vm1332_vm8, %v1336_v62, %v1337_v63 }
 0x11a   : > { %v3518_v25 = vpack.i.bf16 %v4355_v21, %v1237_v20  ;;  %v3513_v26 = vpack.i.bf16 %v1191_v23, %v1188_v22  ;;  %v3523_v38 = vpack.i.bf16 %v4364_v28, %v1286_v34 }
 0x11b   : > { %v3370_v27 = vpop.f32.mrb[20].mxu0 }
 0x11c   : > { %v955_v30 = vmax.f32 %v677_v17, %v3370_v27  ;;  %3519 = vrot.lane.b32.xlu1 %v3518_v25, %s4033_s16  ;;  %3514 = vrot.lane.b32.xlu0 %v3513_v26, %s4034_s17  ;;  %v687_v31 = vpop.f32.mrb[21].mxu0 }
 0x11d   : > { %v1029_v32 = vld [vmem:[#allocation2 + $0x40] ss:$2 sm:$0xf]  ;;  %v1077_v33 = vld [vmem:[#allocation2 + $0x41] ss:$2 sm:$0xf] }
 0x11e   : > { %v1027_v35 = vld [vmem:[#allocation2 + $0x30] ss:$2 sm:$0xff]  ;;  %v1075_v36 = vld [vmem:[#allocation2 + $0x31] ss:$2 sm:$0xff]  ;;  %992 = vst.msk [vmem:[#allocation2 + $0x48] sm:$0xff] %vm982_vm4, %v955_v30  ;;  %v1119_v37 = vmax.f32 %v1029_v32, %v1077_v33 }
 0x11f   : > { %v1118_v40 = vmax.f32 %v1027_v35, %v1075_v36  ;;  %v3373_v41 = vpop.f32.mrb[22].mxu0 }
 0x120   : > { %v4378_v42 = vadd.f32 %v4306_v46, %v1119_v37  ;;  %v957_v43 = vmax.f32 %v687_v31, %v3373_v41  ;;  %3524 = vrot.lane.b32.xlu1 %v3523_v38, %s4035_s26  ;;  %v697_v44 = vpop.f32.mrb[23].mxu0 }
 0x121   : > { %v4385_v47 = vadd.f32 %v4306_v46, %v1118_v40  ;;  %v956_v48 = vmax.f32 %v3367_v12, %v697_v44 }
 0x122   : > { %v1242_v49 = vrot.slane %v4378_v42, 2  ;;  %v1193_v50 = vrot.slane %v4378_v42, 1  ;;  %994 = vst.msk [vmem:[#allocation2 + $0x58] sm:$0xff] %vm982_vm4, %v957_v43  ;;  %v1340_v52 = vrot.slane %v4378_v42, 4  ;;  %v1291_v22 = vrot.slane %v4378_v42, 3 }
 0x123   : > { %v1241_v53 = vrot.slane %v4385_v47, 2  ;;  %v1192_v54 = vrot.slane %v4385_v47, 1  ;;  %993 = vst.msk [vmem:[#allocation2 + $0x50] sm:$0xff] %vm982_vm4, %v956_v48  ;;  %v3376_v56 = vpop.f32.mrb[24].mxu0  ;;  %v3528_v57 = vpack.i.bf16 %v4385_v47, %v4333_v5  ;;  %v1339_v58 = vrot.slane %v4385_v47, 4 }
 0x124   : > { %v707_v59 = vpop.f32.mrb[25].mxu0 }
 0x125   : > { %v4398_v60 = vsel %vm1234_vm5, %v1241_v53, %v1242_v49  ;;  %v1194_v61 = vsel %vm1185_vm6, %v1192_v54, %v1193_v50  ;;  %3529 = vrot.lane.b32.xlu0 %v3528_v57, %s4034_s17  ;;  %v4407_v4 = vsel %vm1332_vm8, %v1339_v58, %v1340_v52 }
 0x126   : > { %v3538_v0 = vpack.i.bf16 %v4398_v60, %v4355_v21  ;;  %v3533_v2 = vpack.i.bf16 %v1194_v61, %v1191_v23  ;;  %v3543_v12 = vpack.i.bf16 %v4407_v4, %v4412_v8  ;;  %v1290_v21 = vrot.slane %v4385_v47, 3 }
 0x127   : > { %v3379_v3 = vpop.f32.mrb[26].mxu0 }
 0x128   : > { %v958_v6 = vmax.f32 %v707_v59, %v3379_v3  ;;  %3534 = vrot.lane.b32.xlu1 %v3533_v2, %s4033_s16  ;;  %v717_v7 = vpop.f32.mrb[27].mxu0  ;;  %v4440_v35 = vsel %vm1283_vm7, %v1290_v21, %v1291_v22 }
 0x129   : > { %3539 = vrot.lane.b32.xlu0 %v3538_v0, %s4035_s26  ;;  %v1033_v9 = vld [vmem:[#allocation2 + $0x58] ss:$2 sm:$0xf]  ;;  %v1081_v1 = vld [vmem:[#allocation2 + $0x59] ss:$2 sm:$0xf] }
 0x12a   : > { %v1031_v10 = vld [vmem:[#allocation2 + $0x48] ss:$2 sm:$0xff]  ;;  %v1079_v11 = vld [vmem:[#allocation2 + $0x49] ss:$2 sm:$0xff]  ;;  %995 = vst.msk [vmem:[#allocation2 + $0x60] sm:$0xff] %vm982_vm4, %v958_v6  ;;  %v1121_v13 = vmax.f32 %v1033_v9, %v1081_v1 }
 0x12b   : > { %v1120_v14 = vmax.f32 %v1031_v10, %v1079_v11  ;;  %v3382_v15 = vpop.f32.mrb[28].mxu0 }
 0x12c   : > { %v960_v16 = vmax.f32 %v717_v7, %v3382_v15  ;;  %3544 = vrot.lane.b32.xlu1 %v3543_v12, %s4034_s17  ;;  %v727_v17 = vpop.f32.mrb[29].mxu0  ;;  %v4419_v18 = vadd.f32 %v4306_v46, %v1121_v13 }
 0x12d   : > { %v959_v19 = vmax.f32 %v3376_v56, %v727_v17  ;;  %v4422_v20 = vadd.f32 %v4306_v46, %v1120_v14 }
 0x12e   : > { %997 = vst.msk [vmem:[#allocation2 + $0x70] sm:$0xff] %vm982_vm4, %v960_v16  ;;  %v1294_v23 = vrot.slane %v4419_v18, 3  ;;  %v1196_v24 = vrot.slane %v4419_v18, 1  ;;  %v1343_v25 = vrot.slane %v4419_v18, 4  ;;  %v1245_v34 = vrot.slane %v4419_v18, 2 }
 0x12f   : > { %996 = vst.msk [vmem:[#allocation2 + $0x68] sm:$0xff] %vm982_vm4, %v959_v19  ;;  %v3548_v26 = vpack.i.bf16 %v4422_v20, %v4385_v47  ;;  %v3385_v27 = vpop.f32.mrb[30].mxu0  ;;  %v1293_v29 = vrot.slane %v4422_v20, 3  ;;  %v1195_v30 = vrot.slane %v4422_v20, 1  ;;  %v1342_v31 = vrot.slane %v4422_v20, 4 }
 0x130   : > { %v737_v32 = vpop.f32.mrb[31].mxu0  ;;  %v1244_v33 = vrot.slane %v4422_v20, 2 }
 0x131   : > { %3549 = vrot.lane.b32.xlu1 %v3548_v26, %s4033_s16  ;;  %v4445_v36 = vsel %vm1283_vm7, %v1293_v29, %v1294_v23  ;;  %v4450_v37 = vsel %vm1185_vm6, %v1195_v30, %v1196_v24  ;;  %v4456_v41 = vsel %vm1332_vm8, %v1342_v31, %v1343_v25 }
 0x132   : > { %5662 = vst [vmem:[#allocation7_spill] sm:$0xff] %v4445_v36  ;;  %v3568_v38 = vpack.i.bf16 %v4445_v36, %v4440_v35  ;;  %v3553_v39 = vpack.i.bf16 %v4450_v37, %v1194_v61  ;;  %v4462_v44 = vsel %vm1234_vm5, %v1244_v33, %v1245_v34  ;;  %v3573_v52 = vpack.i.bf16 %v4456_v41, %v4407_v4 }
 0x133   : > { %v3388_v40 = vpop.f32.mrb[32].mxu0  ;;  %v3558_v57 = vpack.i.bf16 %v4462_v44, %v4398_v60 }
 0x134   : > { %3569 = vrot.lane.b32.xlu0 %v3568_v38, %s4034_s17  ;;  %v961_v42 = vmax.f32 %v737_v32, %v3388_v40  ;;  %v747_v43 = vpop.f32.mrb[33].mxu0 }
 0x135   : > { %3554 = vrot.lane.b32.xlu1 %v3553_v39, %s4034_s17  ;;  %v1037_v45 = vld [vmem:[#allocation2 + $0x70] ss:$2 sm:$0xf]  ;;  %v1085_v48 = vld [vmem:[#allocation2 + $0x71] ss:$2 sm:$0xf] }
 0x136   : > { %v1035_v49 = vld [vmem:[#allocation2 + $0x60] ss:$2 sm:$0xff]  ;;  %v1083_v50 = vld [vmem:[#allocation2 + $0x61] ss:$2 sm:$0xff]  ;;  %998 = vst.msk [vmem:[#allocation2 + $0x78] sm:$0xff] %vm982_vm4, %v961_v42  ;;  %v1123_v53 = vmax.f32 %v1037_v45, %v1085_v48 }
 0x137   : > { %v1122_v54 = vmax.f32 %v1035_v49, %v1083_v50  ;;  %v3391_v56 = vpop.f32.mrb[34].mxu0 }
 0x138   : > { %v963_v58 = vmax.f32 %v747_v43, %v3391_v56  ;;  %3574 = vrot.lane.b32.xlu0 %v3573_v52, %s4033_s16  ;;  %v757_v59 = vpop.f32.mrb[35].mxu0  ;;  %v4472_v61 = vadd.f32 %v4306_v46, %v1123_v53 }
 0x139   : > { %v4475_v62 = vadd.f32 %v4306_v46, %v1122_v54  ;;  %v962_v63 = vmax.f32 %v3385_v27, %v757_v59  ;;  %3559 = vrot.lane.b32.xlu1 %v3558_v57, %s4033_s16 }
 0x13a   : > { %1000 = vst.msk [vmem:[#allocation2 + $0x88] sm:$0xff] %vm982_vm4, %v963_v58  ;;  %v4483_v6 = vrot.slane %v4472_v61, 1  ;;  %v4489_v1 = vrot.slane %v4472_v61, 2  ;;  %v1297_v10 = vrot.slane %v4472_v61, 3  ;;  %v1346_v50 = vrot.slane %v4472_v61, 4 }
 0x13b   : > { %999 = vst.msk [vmem:[#allocation2 + $0x80] sm:$0xff] %vm982_vm4, %v962_v63  ;;  %v3583_v0 = vpack.i.bf16 %v4475_v62, %v4422_v20  ;;  %v3394_v2 = vpop.f32.mrb[36].mxu0  ;;  %v1198_v7 = vrot.slane %v4475_v62, 1  ;;  %v1247_v14 = vrot.slane %v4475_v62, 2  ;;  %v1296_v15 = vrot.slane %v4475_v62, 3 }
 0x13c   : > { %v767_v3 = vpop.f32.mrb[37].mxu0  ;;  %v3593_v27 = vpack.i.bf16 %v4483_v6, %v1196_v24  ;;  %v3598_v40 = vpack.i.bf16 %v4489_v1, %v1245_v34  ;;  %v1345_v49 = vrot.slane %v4475_v62, 4  ;;  %v2079_v56 = vrot.slane %v1297_v10, 1 }
 0x13d   : > { %3564 = vrot.lane.b32.xlu1 %v3568_v38, %s4035_s26  ;;  %3584 = vrot.lane.b32.xlu0 %v3583_v0, %s4034_s17  ;;  %v4494_v13 = vsel %vm1185_vm6, %v1198_v7, %v4483_v6  ;;  %v4508_v32 = vsel %vm1234_vm5, %v1247_v14, %v4489_v1  ;;  %v4519_v24 = vsel %vm1283_vm7, %v1296_v15, %v1297_v10 }
 0x13e   : > { %v3608_v29 = vpack.i.bf16 %v4494_v13, %v4450_v37  ;;  %5663 = vst [vmem:[#allocation8_spill] sm:$0xff] %v4508_v32  ;;  %5664 = vst [vmem:[#allocation9_spill] sm:$0xff] %v4519_v24  ;;  %v3613_v42 = vpack.i.bf16 %v4508_v32, %v4462_v44  ;;  %v2078_v52 = vrot.slane %v4519_v24, 1  ;;  %v3603_v57 = vpack.i.bf16 %v1297_v10, %v1294_v23 }
 0x13f   : > { %v3397_v9 = vpop.f32.mrb[38].mxu0 }
 0x140   : > { %v964_v11 = vmax.f32 %v767_v3, %v3397_v9  ;;  %v777_v12 = vpop.f32.mrb[39].mxu0  ;;  %v4551_v3 = vsel %vm1332_vm8, %v1345_v49, %v1346_v50  ;;  %v4554_v7 = vsel %vm1185_vm6, %v2078_v52, %v2079_v56 }
 0x141   : > { %3579 = vrot.lane.b32.xlu1 %v3553_v39, %s4035_s26  ;;  %3589 = vrot.lane.b32.xlu0 %v3583_v0, %s4035_s26  ;;  %v1041_v16 = vld [vmem:[#allocation2 + $0x88] ss:$2 sm:$0xf]  ;;  %v1089_v17 = vld [vmem:[#allocation2 + $0x89] ss:$2 sm:$0xf]  ;;  %v3618_v15 = vpack.i.bf16 %v4551_v3, %v4456_v41 }
 0x142   : > { %v1039_v19 = vld [vmem:[#allocation2 + $0x78] ss:$2 sm:$0xff]  ;;  %v1087_v21 = vld [vmem:[#allocation2 + $0x79] ss:$2 sm:$0xff]  ;;  %1001 = vst.msk [vmem:[#allocation2 + $0x90] sm:$0xff] %vm982_vm4, %v964_v11  ;;  %v1125_v22 = vmax.f32 %v1041_v16, %v1089_v17  ;;  %5666 = vst [vmem:[#allocation11_spill] sm:$0xff] %v4554_v7 }
 0x143   : > { %v1124_v25 = vmax.f32 %v1039_v19, %v1087_v21  ;;  %v3400_v26 = vpop.f32.mrb[40].mxu0 }
 0x144   : > { %v966_v30 = vmax.f32 %v777_v12, %v3400_v26  ;;  %v787_v31 = vpop.f32.mrb[41].mxu0  ;;  %v4511_v33 = vadd.f32 %v4306_v46, %v1125_v22 }
 0x145   : > { %v4514_v38 = vadd.f32 %v4306_v46, %v1124_v25  ;;  %v965_v39 = vmax.f32 %v3394_v2, %v787_v31  ;;  %3594 = vrot.lane.b32.xlu1 %v3593_v27, %s4034_s17  ;;  %3609 = vrot.lane.b32.xlu0 %v3608_v29, %s4033_s16 }
 0x146   : > { %1003 = vst.msk [vmem:[#allocation2 + $0xa0] sm:$0xff] %vm982_vm4, %v966_v30  ;;  %v4523_v37 = vrot.slane %v4511_v33, 3  ;;  %v3623_v58 = vpack.i.bf16 %v4511_v33, %v4472_v61  ;;  %v4548_v63 = vrot.slane %v4511_v33, 1  ;;  %v4569_v17 = vrot.slane %v4511_v33, 2 }
 0x147   : > { %1002 = vst.msk [vmem:[#allocation2 + $0x98] sm:$0xff] %vm982_vm4, %v965_v39  ;;  %v3403_v43 = vpop.f32.mrb[42].mxu0  ;;  %v1299_v45 = vrot.slane %v4514_v38, 3  ;;  %v1201_v22 = vrot.slane %v4514_v38, 1  ;;  %v3628_v29 = vpack.i.bf16 %v4514_v38, %v4475_v62 }
 0x148   : > { %v797_v48 = vpop.f32.mrb[43].mxu0  ;;  %v2088_v53 = vrot.slane %v4523_v37, 1  ;;  %v3633_v16 = vpack.i.bf16 %v4548_v63, %v4483_v6  ;;  %v3638_v6 = vpack.i.bf16 %v4569_v17, %v4489_v1 }
 0x149   : > { %3599 = vrot.lane.b32.xlu1 %v3598_v40, %s4033_s16  ;;  %3614 = vrot.lane.b32.xlu0 %v3613_v42, %s4035_s26  ;;  %v4539_v34 = vsel %vm1283_vm7, %v1299_v45, %v4523_v37  ;;  %v4582_v40 = vsel %vm1185_vm6, %v1201_v22, %v4548_v63  ;;  %v1348_v42 = vrot.slane %v4514_v38, 4  ;;  %v1250_v45 = vrot.slane %v4514_v38, 2 }
 0x14a   : > { %5665 = vst [vmem:[#allocation10_spill] sm:$0xff] %v4539_v34  ;;  %v2087_v54 = vrot.slane %v4539_v34, 1  ;;  %v3643_v49 = vpack.i.bf16 %v4582_v40, %v4494_v13 }
 0x14b   : > { %v3406_v59 = vpop.f32.mrb[44].mxu0 }
 0x14c   : > { %v967_v0 = vmax.f32 %v797_v48, %v3406_v59  ;;  %v807_v2 = vpop.f32.mrb[45].mxu0  ;;  %v4557_v9 = vsel %vm1185_vm6, %v2087_v54, %v2088_v53  ;;  %v3658_v48 = vpack.i.bf16 %v4539_v34, %v4519_v24 }
 0x14d   : > { %5667 = vst [vmem:[#allocation12_spill] sm:$0xff] %v4557_v9  ;;  %3604 = vrot.lane.b32.xlu1 %v3603_v57, %s4035_s26  ;;  %3624 = vrot.lane.b32.xlu0 %v3623_v58, %s4034_s17  ;;  %v1045_v10 = vld [vmem:[#allocation2 + $0xa0] ss:$2 sm:$0xf]  ;;  %v4604_v57 = vsel %vm1234_vm5, %v1250_v45, %v4569_v17 }
 0x14e   : > { %1004 = vst.msk [vmem:[#allocation2 + $0xa8] sm:$0xff] %vm982_vm4, %v967_v0  ;;  %v1043_v11 = vld [vmem:[#allocation2 + $0x90] ss:$2 sm:$0xff]  ;;  %v1091_v12 = vld [vmem:[#allocation2 + $0x91] ss:$2 sm:$0xff]  ;;  %5668 = vst [vmem:[#allocation13_spill] sm:$0xff] %v4604_v57 }
 0x14f   : > { %v3409_v14 = vpop.f32.mrb[46].mxu0  ;;  %v1093_v25 = vld [vmem:[#allocation2 + $0xa1] ss:$2 sm:$0xf]  ;;  %v1126_v27 = vmax.f32 %v1043_v11, %v1091_v12 }
 0x150   : > { %v969_v19 = vmax.f32 %v807_v2, %v3409_v14  ;;  %v817_v21 = vpop.f32.mrb[47].mxu0  ;;  %v1127_v31 = vmax.f32 %v1045_v10, %v1093_v25 }
 0x151   : > { %v968_v26 = vmax.f32 %v3403_v43, %v817_v21  ;;  %3619 = vrot.lane.b32.xlu1 %v3618_v15, %s4034_s17  ;;  %3634 = vrot.lane.b32.xlu0 %v3633_v16, %s4033_s16  ;;  %v1349_v43 = vrot.slane %v4511_v33, 4  ;;  %v4590_v1 = vadd.f32 %v4306_v46, %v1126_v27  ;;  %v3648_v15 = vpack.i.bf16 %v4604_v57, %v4508_v32 }
 0x152   : > { %1006 = vst.msk [vmem:[#allocation2 + $0xb8] sm:$0xff] %vm982_vm4, %v969_v19  ;;  %v4597_v52 = vadd.f32 %v4306_v46, %v1127_v31 }
 0x153   : > { %1005 = vst.msk [vmem:[#allocation2 + $0xb0] sm:$0xff] %vm982_vm4, %v968_v26  ;;  %v3412_v30 = vpop.f32.mrb[48].mxu0  ;;  %v4600_v56 = vsel %vm1332_vm8, %v1348_v42, %v1349_v43  ;;  %v1302_v58 = vrot.slane %v4590_v1, 3  ;;  %v1204_v43 = vrot.slane %v4590_v1, 1 }
 0x154   : > { %v827_v39 = vpop.f32.mrb[49].mxu0  ;;  %v3663_v14 = vpack.i.bf16 %v4600_v56, %v4551_v3  ;;  %v4615_v16 = vrot.slane %v4597_v52, 3 }
 0x155   : > { %3639 = vrot.lane.b32.xlu0 %v3638_v6, %s4035_s26  ;;  %3629 = vrot.lane.b32.xlu1 %v3628_v29, %s4033_s16  ;;  %v3673_v29 = vpack.i.bf16 %v4590_v1, %v4514_v38 }
 0x156   : > { %v4627_v27 = vsel %vm1283_vm7, %v1302_v58, %v4615_v16  ;;  %v1352_v58 = vrot.slane %v4597_v52, 4 }
 0x157   : > { %v3415_v50 = vpop.f32.mrb[50].mxu0  ;;  %5670 = vst [vmem:[#allocation15_spill] sm:$0xff] %v4627_v27  ;;  %v2096_v45 = vrot.slane %v4627_v27, 1 }
 0x158   : > { %v970_v53 = vmax.f32 %v827_v39, %v3415_v50  ;;  %v837_v54 = vpop.f32.mrb[51].mxu0  ;;  %v2097_v50 = vrot.slane %v4615_v16, 1 }
 0x159   : > { %3659 = vrot.lane.b32.xlu0 %v3658_v48, %s4034_s17  ;;  %3644 = vrot.lane.b32.xlu1 %v3643_v49, %s4034_s17  ;;  %v1049_v13 = vld [vmem:[#allocation2 + $0xb8] ss:$2 sm:$0xf]  ;;  %v1097_v59 = vld [vmem:[#allocation2 + $0xb9] ss:$2 sm:$0xf] }
 0x15a   : > { %v1047_v0 = vld [vmem:[#allocation2 + $0xa8] ss:$2 sm:$0xff]  ;;  %v1095_v2 = vld [vmem:[#allocation2 + $0xa9] ss:$2 sm:$0xff]  ;;  %1007 = vst.msk [vmem:[#allocation2 + $0xc0] sm:$0xff] %vm982_vm4, %v970_v53  ;;  %v1129_v10 = vmax.f32 %v1049_v13, %v1097_v59 }
 0x15b   : > { %v1128_v11 = vmax.f32 %v1047_v0, %v1095_v2  ;;  %v3418_v12 = vpop.f32.mrb[52].mxu0  ;;  %v1351_v0 = vrot.slane %v4590_v1, 4  ;;  %v1253_v2 = vrot.slane %v4590_v1, 2 }
 0x15c   : > { %v972_v19 = vmax.f32 %v837_v54, %v3418_v12  ;;  %v847_v21 = vpop.f32.mrb[53].mxu0  ;;  %v4618_v22 = vadd.f32 %v4306_v46, %v1129_v10  ;;  %v4655_v10 = vrot.slane %v4597_v52, 2 }
 0x15d   : > { %v4621_v25 = vadd.f32 %v4306_v46, %v1128_v11  ;;  %v971_v26 = vmax.f32 %v3412_v30, %v847_v21  ;;  %3664 = vrot.lane.b32.xlu0 %v3663_v14, %s4033_s16  ;;  %3649 = vrot.lane.b32.xlu1 %v3648_v15, %s4033_s16  ;;  %v4637_v30 = vrot.slane %v4597_v52, 1  ;;  %v4660_v14 = vsel %vm1185_vm6, %v2096_v45, %v2097_v50 }
 0x15e   : > { %5669 = vst [vmem:[#allocation14_spill] sm:$0xff] %v4618_v22  ;;  %1009 = vst.msk [vmem:[#allocation2 + $0xd0] sm:$0xff] %vm982_vm4, %v972_v19  ;;  %v4631_v6 = vrot.slane %v4618_v22, 3  ;;  %v4674_v50 = vsel %vm1332_vm8, %v1351_v0, %v1352_v58 }
 0x15f   : > { %1008 = vst.msk [vmem:[#allocation2 + $0xc8] sm:$0xff] %vm982_vm4, %v971_v26  ;;  %v3421_v31 = vpop.f32.mrb[54].mxu0  ;;  %v1305_v39 = vrot.slane %v4621_v25, 3  ;;  %v1206_v12 = vsel %vm1185_vm6, %v1204_v43, %v4637_v30  ;;  %5672 = vst [vmem:[#allocation17_spill] sm:$0xff] %v4660_v14  ;;  %v3683_v26 = vpack.i.bf16 %v4637_v30, %v4548_v63  ;;  %v3934_v63 = vld [vmem:[%s5633_s3 + $0xc0] sm:$0xff]  }
 0x160   : > { %v857_v42 = vpop.f32.mrb[55].mxu0  ;;  %v2106_v53 = vrot.slane %v4631_v6, 1  ;;  %5674 = vst [vmem:[#allocation19_spill] sm:$0xff] %v4674_v50  ;;  %3244 = vmatprep.subr.bf16.mxu1 %v3934_v63 }
 0x161   : > { %3654 = vrot.lane.b32.xlu1 %v3658_v48, %s4035_s26  ;;  %3674 = vrot.lane.b32.xlu0 %v3673_v29, %s4034_s17  ;;  %v4648_v54 = vsel %vm1283_vm7, %v1305_v39, %v4631_v6  ;;  %v3688_v39 = vpack.i.bf16 %v1206_v12, %v4582_v40  ;;  %v3698_v40 = vpack.i.bf16 %v4674_v50, %v4600_v56 }
 0x162   : > { %5671 = vst [vmem:[#allocation16_spill] sm:$0xff] %v4648_v54  ;;  %v2105_v13 = vrot.slane %v4648_v54, 1 }
 0x163   : > { %v3424_v59 = vpop.f32.mrb[56].mxu0 }
 0x164   : > { %v973_v11 = vmax.f32 %v857_v42, %v3424_v59  ;;  %v867_v48 = vpop.f32.mrb[57].mxu0  ;;  %v4663_v15 = vsel %vm1185_vm6, %v2105_v13, %v2106_v53 }
 0x165   : > { %5673 = vst [vmem:[#allocation18_spill] sm:$0xff] %v4663_v15  ;;  %3669 = vrot.lane.b32.xlu1 %v3643_v49, %s4035_s26  ;;  %3679 = vrot.lane.b32.xlu0 %v3673_v29, %s4035_s26  ;;  %v1053_v42 = vld [vmem:[#allocation2 + $0xd0] ss:$2 sm:$0xf]  ;;  %v4678_v49 = vsel %vm1234_vm5, %v1253_v2, %v4655_v10  ;;  %v1207_v2 = vrot.slane %v4621_v25, 1 }
 0x166   : > { %1010 = vst.msk [vmem:[#allocation2 + $0xd8] sm:$0xff] %vm982_vm4, %v973_v11  ;;  %5675 = vst [vmem:[#allocation20_spill] sm:$0xff] %v4678_v49  ;;  %v1101_v29 = vld [vmem:[#allocation2 + $0xd1] ss:$2 sm:$0xf]  ;;  %v3693_v58 = vpack.i.bf16 %v4678_v49, %v4604_v57  ;;  %v4693_v11 = vrot.slane %v4618_v22, 1 }
 0x167   : > { %v3427_v21 = vpop.f32.mrb[58].mxu0  ;;  %v1051_v53 = vld [vmem:[#allocation2 + $0xc0] ss:$2 sm:$0xff]  ;;  %v1099_v13 = vld [vmem:[#allocation2 + $0xc1] ss:$2 sm:$0xff] }
 0x168   : > { %v975_v43 = vmax.f32 %v867_v48, %v3427_v21  ;;  %v877_v45 = vpop.f32.mrb[59].mxu0  ;;  %v1131_v21 = vmax.f32 %v1053_v42, %v1101_v29 }
 0x169   : > { %v974_v59 = vmax.f32 %v3421_v31, %v877_v45  ;;  %3684 = vrot.lane.b32.xlu1 %v3683_v26, %s4034_s17  ;;  %3689 = vrot.lane.b32.xlu0 %v3688_v39, %s4033_s16  ;;  %v1130_v31 = vmax.f32 %v1051_v53, %v1099_v13  ;;  %v3703_v26 = vpack.i.bf16 %v4618_v22, %v4597_v52  ;;  %v1355_v39 = vrot.slane %v4618_v22, 4 }
 0x16a   : > { %1012 = vst.msk [vmem:[#allocation2 + $0xe8] sm:$0xff] %vm982_vm4, %v975_v43  ;;  %v3708_v43 = vpack.i.bf16 %v4621_v25, %v4590_v1  ;;  %v1354_v45 = vrot.slane %v4621_v25, 4  ;;  %v1256_v53 = vrot.slane %v4621_v25, 2  ;;  %v4705_v13 = vrot.slane %v4618_v22, 2 }
 0x16b   : > { %1011 = vst.msk [vmem:[#allocation2 + $0xe0] sm:$0xff] %vm982_vm4, %v974_v59  ;;  %v3430_v0 = vpop.f32.mrb[60].mxu0  ;;  %v4708_v29 = vadd.f32 %v4306_v46, %v1130_v31  ;;  %v4712_v59 = vsel %vm1185_vm6, %v1207_v2, %v4693_v11 }
 0x16c   : > { %v887_v48 = vpop.f32.mrb[61].mxu0  ;;  %v4732_v9 = vsel %vm1234_vm5, %v1256_v53, %v4705_v13 }
 0x16d   : > { %3699 = vrot.lane.b32.xlu1 %v3698_v40, %s4034_s17  ;;  %3694 = vrot.lane.b32.xlu0 %v3693_v58, %s4035_s26  ;;  %5676 = vst [vmem:[#allocation21_spill] sm:$0xff] %v4708_v29  ;;  %v4715_v58 = vadd.f32 %v4306_v46, %v1131_v21  ;;  %v1445_v7 = vrot.slane %v4708_v29, 3  ;;  %v3728_v21 = vpack.i.bf16 %v4648_v54, %v4627_v27  ;;  %5679 = vst [vmem:[#allocation24_spill] sm:$0xff] %v4732_v9 }
 0x16e   : > { %v3718_v53 = vpack.i.bf16 %v4732_v9, %v4678_v49 }
 0x16f   : > { %v3433_v42 = vpop.f32.mrb[62].mxu0  ;;  %5677 = vst [vmem:[#allocation22_spill] sm:$0xff] %v4715_v58  ;;  %v4722_v2 = vrot.slane %v4715_v58, 3 }
 0x170   : > { %v976_v63 = vmax.f32 %v887_v48, %v3433_v42  ;;  %v897_v40 = vpop.f32.mrb[63].mxu0 }
 0x171   : > { %3704 = vrot.lane.b32.xlu0 %v3703_v26, %s4034_s17  ;;  %3709 = vrot.lane.b32.xlu1 %v3708_v43, %s4033_s16  ;;  %v1057_v19 = vld [vmem:[#allocation2 + $0xe8] ss:$2 sm:$0xf]  ;;  %v1105_v23 = vld [vmem:[#allocation2 + $0xe9] ss:$2 sm:$0xf]  ;;  %v3713_v26 = vpack.i.bf16 %v4712_v59, %v1206_v12  ;;  %v4728_v43 = vsel %vm1332_vm8, %v1354_v45, %v1355_v39 }
 0x172   : > { %v1055_v14 = vld [vmem:[#allocation2 + $0xd8] ss:$2 sm:$0xff]  ;;  %v1103_v15 = vld [vmem:[#allocation2 + $0xd9] ss:$2 sm:$0xff]  ;;  %1013 = vst.msk [vmem:[#allocation2 + $0xf0] sm:$0xff] %vm982_vm4, %v976_v63  ;;  %v1133_v31 = vmax.f32 %v1057_v19, %v1105_v23  ;;  %5678 = vst [vmem:[#allocation23_spill] sm:$0xff] %v4728_v43  ;;  %v3733_v45 = vpack.i.bf16 %v4728_v43, %v4674_v50 }
 0x173   : > { %v1132_v48 = vmax.f32 %v1055_v14, %v1103_v15  ;;  %v3436_v42 = vpop.f32.mrb[64].mxu0  ;;  %v4745_v15 = vsel %vm1283_vm7, %v1445_v7, %v4722_v2 }
 0x174   : > { %v978_v23 = vmax.f32 %v897_v40, %v3436_v42  ;;  %v907_v19 = vpop.f32.mrb[65].mxu0  ;;  %v4735_v63 = vadd.f32 %v4306_v46, %v1133_v31  ;;  %v2115_v42 = vrot.slane %v4722_v2, 1 }
 0x175   : > { %v4738_v14 = vadd.f32 %v4306_v46, %v1132_v48  ;;  %3729 = vrot.lane.b32.xlu0 %v3728_v21, %s4034_s17  ;;  %3714 = vrot.lane.b32.xlu1 %v3713_v26, %s4034_s17  ;;  %v977_v12 = vmax.f32 %v3430_v0, %v907_v19  ;;  %v2114_v48 = vrot.slane %v4745_v15, 1 }
 0x176   : > { %1015 = vst.msk [vmem:[#allocation2 + $0x100] sm:$0xff] %vm982_vm4, %v978_v23  ;;  %v4748_v39 = vrot.slane %v4735_v63, 3 }
 0x177   : > { %1014 = vst.msk [vmem:[#allocation2 + $0xf8] sm:$0xff] %vm982_vm4, %v977_v12  ;;  %v3439_v40 = vpop.f32.mrb[66].mxu0  ;;  %v1547_v0 = vrot.slane %v4738_v14, 3  ;;  %v3743_v12 = vpack.i.bf16 %v4708_v29, %v4621_v25  ;;  %v4775_v49 = vsel %vm1185_vm6, %v2114_v48, %v2115_v42  ;;  %v1418_v42 = vrot.slane %v4708_v29, 2 }
 0x178   : > { %v917_v31 = vpop.f32.mrb[67].mxu0  ;;  %v2124_v23 = vrot.slane %v4748_v39, 1  ;;  %5680 = vst [vmem:[#allocation25_spill] sm:$0xff] %v4775_v49 }
 0x179   : > { %3734 = vrot.lane.b32.xlu0 %v3733_v45, %s4033_s16  ;;  %3719 = vrot.lane.b32.xlu1 %v3718_v53, %s4033_s16  ;;  %v4760_v7 = vsel %vm1283_vm7, %v1547_v0, %v4748_v39  ;;  %v1391_v45 = vrot.slane %v4708_v29, 1  ;;  %v4770_v53 = vrot.slane %v4715_v58, 1 }
 0x17a   : > { %v2123_v19 = vrot.slane %v4760_v7, 1 }
 0x17b   : > { %v3442_v22 = vpop.f32.mrb[68].mxu0  ;;  %v4788_v48 = vsel %vm1185_vm6, %v1391_v45, %v4770_v53 }
 0x17c   : > { %v979_v54 = vmax.f32 %v917_v31, %v3442_v22  ;;  %v927_v0 = vpop.f32.mrb[69].mxu0  ;;  %v4778_v24 = vsel %vm1185_vm6, %v2123_v19, %v2124_v23  ;;  %v1333_v22 = vrot.slane %v4318_v55, 4 }
 0x17d   : > { %3724 = vrot.lane.b32.xlu1 %v3728_v21, %s4035_s26  ;;  %3744 = vrot.lane.b32.xlu0 %v3743_v12, %s4034_s17  ;;  %v1061_v27 = vld [vmem:[#allocation2 + $0x100] ss:$2 sm:$0xf]  ;;  %v1109_v34 = vld [vmem:[#allocation2 + $0x101] ss:$2 sm:$0xf] }
 0x17e   : > { %5681 = vst [vmem:[#allocation26_spill] sm:$0xff] %v4778_v24  ;;  %1016 = vst.msk [vmem:[#allocation2 + $0x108] sm:$0xff] %vm982_vm4, %v979_v54  ;;  %v1059_v36 = vld [vmem:[#allocation2 + $0xf0] ss:$2 sm:$0xff]  ;;  %v1107_v57 = vld [vmem:[#allocation2 + $0xf1] ss:$2 sm:$0xff]  ;;  %v1135_v32 = vmax.f32 %v1061_v27, %v1109_v34  ;;  %v3768_v27 = vpack.i.bf16 %v4655_v10, %v4569_v17 }
 0x17f   : > { %v4784_v21 = vrot.slane %v4715_v58, 2  ;;  %v3445_v31 = vpop.f32.mrb[70].mxu0  ;;  %v1134_v50 = vmax.f32 %v1059_v36, %v1107_v57 }
 0x180   : > { %v981_v23 = vmax.f32 %v927_v0, %v3445_v31  ;;  %v937_v19 = vpop.f32.mrb[71].mxu0  ;;  %v4792_v54 = vadd.f32 %v4306_v46, %v1135_v32  ;;  %v3753_v32 = vpack.i.bf16 %v4788_v48, %v4712_v59  ;;  %v3778_v59 = vpack.i.bf16 %v4615_v16, %v4523_v37 }
 0x181   : > { %3739 = vrot.lane.b32.xlu1 %v3713_v26, %s4035_s26  ;;  %3749 = vrot.lane.b32.xlu0 %v3743_v12, %s4035_s26  ;;  %v980_v34 = vmax.f32 %v3439_v40, %v937_v19  ;;  %v4798_v36 = vadd.f32 %v4306_v46, %v1134_v50  ;;  %v4810_v26 = vsel %vm1234_vm5, %v1418_v42, %v4784_v21  ;;  %v1456_v40 = vrot.slane %v4708_v29, 4 }
 0x182   : > { %1018 = vst.msk [vmem:[#allocation2 + $0x118] sm:$0xff] %vm982_vm4, %v981_v23  ;;  %v4801_v57 = vrot.slane %v4792_v54, 3  ;;  %5682 = vst [vmem:[#allocation27_spill] sm:$0xff] %v4810_v26  ;;  %v1457_v50 = vrot.slane %v4715_v58, 4  ;;  %v3758_v45 = vpack.i.bf16 %v4810_v26, %v4732_v9 }
 0x183   : > { %1017 = vst.msk [vmem:[#allocation2 + $0x110] sm:$0xff] %vm982_vm4, %v980_v34  ;;  %v1797_v12 = vrot.slane %v4798_v36, 3 }
 0x184   : > { %v2133_v17 = vrot.slane %v4801_v57, 1  ;;  %v4827_v31 = vsel %vm1332_vm8, %v1456_v40, %v1457_v50  ;;  %v3763_v40 = vpack.i.bf16 %v4693_v11, %v4637_v30 }
 0x185   : > { %3769 = vrot.lane.b32.xlu1 %v3768_v27, %s4033_s16  ;;  %3754 = vrot.lane.b32.xlu0 %v3753_v32, %s4033_s16  ;;  %v4824_v0 = vsel %vm1283_vm7, %v1797_v12, %v4801_v57  ;;  %v3783_v32 = vpack.i.bf16 %v4827_v31, %v4728_v43 }
 0x186   : > { %v2132_v42 = vrot.slane %v4824_v0, 1 }
 0x188   : > { %v4833_v27 = vsel %vm1185_vm6, %v2132_v42, %v2133_v17  ;;  %v3793_v17 = vpack.i.bf16 %v4784_v21, %v4810_v26  ;;  %v3773_v42 = vpack.i.bf16 %v4705_v13, %v4655_v10  ;;  %v3798_v10 = vpack.i.bf16 %v4693_v11, %v4735_v63 }
 0x189   : > { %3779 = vrot.lane.b32.xlu1 %v3778_v59, %s4035_s26  ;;  %3759 = vrot.lane.b32.xlu0 %v3758_v45, %s4035_s26  ;;  %v1065_v23 = vld [vmem:[#allocation2 + $0x118] ss:$2 sm:$0xf]  ;;  %v1113_v19 = vld [vmem:[#allocation2 + $0x119] ss:$2 sm:$0xf]  ;;  %v3808_v11 = vpack.i.bf16 %v4738_v14, %v4715_v58 }
 0x18a   : > { %v1063_v34 = vld [vmem:[#allocation2 + $0x108] ss:$2 sm:$0xff]  ;;  %v1111_v37 = vld [vmem:[#allocation2 + $0x109] ss:$2 sm:$0xff]  ;;  %v1137_v16 = vmax.f32 %v1065_v23, %v1113_v19 }
 0x18b   : > { %v1136_v50 = vmax.f32 %v1063_v34, %v1111_v37  ;;  %v4856_v34 = vrot.slane %v4735_v63, 1 }
 0x18c   : > { %v4840_v12 = vadd.f32 %v4306_v46, %v1137_v16  ;;  %v3788_v16 = vpack.i.bf16 %v4770_v53, %v4788_v48 }
 0x18d   : > { %3784 = vrot.lane.b32.xlu1 %v3783_v32, %s4034_s17  ;;  %3764 = vrot.lane.b32.xlu0 %v3763_v40, %s4033_s16  ;;  %v4845_v59 = vadd.f32 %v4306_v46, %v1136_v50  ;;  %v1509_v46 = vrot.slane %v4738_v14, 1 }
 0x18e   : > { %v3520_v45 = vpop.permute.xlu1 %3519  ;;  %v1957_v30 = vrot.slane %v4840_v12, 3  ;;  %v3515_v23 = vpop.permute.xlu0 %3514 }
 0x18f   : > { %v1956_v19 = vrot.slane %v4845_v59, 3  ;;  %v3516_v37 = vunpack.i.l.bf16 %v3515_v23  ;;  %v3517_v40 = vunpack.i.h.bf16 %v3515_v23  ;;  %v3521_v24 = vunpack.i.l.bf16 %v3520_v45 }
 0x190   : > { %v2142_v32 = vrot.slane %v1957_v30, 1  ;;  %v3803_v23 = vpack.i.bf16 %v4738_v14, %v4708_v29 }
 0x191   : > { %3794 = vrot.lane.b32.xlu1 %v3793_v17, %s4033_s16  ;;  %3774 = vrot.lane.b32.xlu0 %v3773_v42, %s4035_s26  ;;  %v1334_v17 = vrot.slane %v4312_v51, 4  ;;  %v1958_v42 = vsel %vm1283_vm7, %v1956_v19, %v1957_v30  ;;  %v4874_v51 = vsel %vm1185_vm6, %v1509_v46, %v4856_v34  ;;  %v3522_v30 = vunpack.i.h.bf16 %v3520_v45 }
 0x192   : > { %v3525_v50 = vpop.permute.xlu1 %3524  ;;  %v2141_v49 = vrot.slane %v1958_v42, 1  ;;  %v1626_v19 = vsel %vm982_vm4, %v4318_v55, %v3516_v37  ;;  %v1627_v42 = vsel %vm982_vm4, %v4333_v5, %v3517_v40  ;;  %v1575_v45 = vrot.slane %v4735_v63, 4 }
 0x193   : > { %v3527_v43 = vunpack.i.h.bf16 %v3525_v50  ;;  %v1335_v55 = vsel %vm1332_vm8, %v1333_v22, %v1334_v17  ;;  %v3828_v5 = vpack.i.bf16 %v4874_v51, %v4788_v48  ;;  %v1635_v37 = vsel %vm1634_vm9, %v1626_v19, %v3521_v24 }
 0x194   : > { %v4879_v26 = vsel %vm1185_vm6, %v2141_v49, %v2142_v32  ;;  %v3813_v49 = vpack.i.bf16 %v4705_v13, %v4856_v34  ;;  %v1574_v32 = vrot.slane %v4738_v14, 4 }
 0x195   : > { %3789 = vrot.lane.b32.xlu0 %v3788_v16, %s4034_s17  ;;  %3799 = vrot.lane.b32.xlu1 %v3798_v10, %s4034_s17  ;;  %v3526_v16 = vunpack.i.l.bf16 %v3525_v50 }
 0x197   : > { %v3530_v10 = vpop.permute.xlu0 %3529  ;;  %v1644_v22 = vsel %vm1643_vm10, %v1635_v37, %v3526_v16 }
 0x198   : > { %v3532_v58 = vunpack.i.h.bf16 %v3530_v10  ;;  %v3531_v9 = vunpack.i.l.bf16 %v3530_v10 }
 0x199   : > { %3809 = vrot.lane.b32.xlu0 %v3808_v11, %s4034_s17  ;;  %3804 = vrot.lane.b32.xlu1 %v3803_v23, %s4033_s16  ;;  %v1636_v23 = vsel %vm1634_vm9, %v1627_v42, %v3522_v30 }
 0x19a   : > { %v3535_v46 = vpop.permute.xlu1 %3534  ;;  %v1652_v29 = vsel %vm982_vm4, %v1335_v55, %v3531_v9  ;;  %v1653_v13 = vsel %vm982_vm4, %v4412_v8, %v3532_v58  ;;  %v1645_v19 = vsel %vm1643_vm10, %v1636_v23, %v3527_v43  ;;  %v3818_v9 = vpack.i.bf16 %v4760_v7, %v4745_v15  ;;  %v3935_v8 = vld [vmem:[%s5633_s3 + $0x80] sm:$0xff]  }
 0x19b   : > { %v3537_v40 = vunpack.i.h.bf16 %v3535_v46  ;;  %v3536_v50 = vunpack.i.l.bf16 %v3535_v46  ;;  %v3540_v11 = vpop.permute.xlu0 %3539  ;;  %v2168_v58 = vpack.c.bf16 %v1645_v19, %v1644_v22  ;;  %v1576_v55 = vsel %vm1332_vm8, %v1574_v32, %v1575_v45  ;;  %v3937_v45 = vld [vmem:[%s5633_s3 + $0x88] sm:$0xff]   ;;  %v3938_v22 = vld [vmem:[%s5633_s3 + $0xd0] sm:$0xff]  }
 0x19c   : > { %v3542_v17 = vunpack.i.h.bf16 %v3540_v11  ;;  %v3541_v10 = vunpack.i.l.bf16 %v3540_v11  ;;  %v1537_v43 = vrot.slane %v4735_v63, 2 }
 0x19d   : > { %3814 = vrot.lane.b32.xlu0 %v3813_v49, %s4033_s16  ;;  %3829 = vrot.lane.b32.xlu1 %v3828_v5, %s4035_s26  ;;  %v1660_v24 = vsel %vm1634_vm9, %v1652_v29, %v3536_v50  ;;  %v1661_v48 = vsel %vm1634_vm9, %v1653_v13, %v3537_v40  ;;  %v3833_v29 = vpack.i.bf16 %v4874_v51, %v4770_v53  ;;  %v3936_v49 = vld [vmem:[%s5633_s3 + $0xc8] sm:$0xff]   ;;  %v1536_v50 = vrot.slane %v4738_v14, 2 }
 0x19e   : > { %v3545_v30 = vpop.permute.xlu1 %3544  ;;  %v1668_v16 = vsel %vm1643_vm10, %v1660_v24, %v3541_v10  ;;  %v1669_v42 = vsel %vm1643_vm10, %v1661_v48, %v3542_v17  ;;  %v3823_v53 = vpack.i.bf16 %v1576_v55, %v4827_v31  ;;  %v3848_v23 = vpack.i.bf16 %v4631_v6, %v1537_v43 }
 0x19f   : > { %v2169_v46 = vpack.c.bf16 %v1669_v42, %v1668_v16  ;;  %v3547_v5 = vunpack.i.h.bf16 %v3545_v30  ;;  %v3546_v37 = vunpack.i.l.bf16 %v3545_v30  ;;  %v3838_v48 = vpack.i.bf16 %v4798_v36, %v4738_v14  ;;  %v3940_v42 = vld [vmem:[%s5633_s3 + $0xd8] sm:$0xff]  }
 0x1a0   : > { %v3858_v16 = vpack.i.bf16 %v4856_v34, %v4874_v51  ;;  %v1725_v51 = vrot.slane %v4798_v36, 1 }
 0x1a1   : > { %2640 = vmatprep.mubr.bf16.mxu1 %v2169_v46  ;;  %3819 = vrot.lane.b32.xlu0 %v3818_v9, %s4034_s17  ;;  %v1677_v17 = vsel %vm982_vm4, %v4440_v35, %v3547_v5  ;;  %v1676_v31 = vsel %vm982_vm4, %v4364_v28, %v3546_v37  ;;  %v4947_v35 = vsel %vm1234_vm5, %v1536_v50, %v1537_v43  ;;  %v3939_v28 = vld [vmem:[%s5633_s3 + $0x90] sm:$0xff]   ;;  %v3941_v5 = vld [vmem:[%s5633_s3 + $0x98] sm:$0xff]  }
 0x1a2   : > { %3834 = vrot.lane.b32.xlu1 %v3833_v29, %s4033_s16  ;;  %2641 = vmatmul.mubr.bf16.vlgmr.msra.gmra.mrb[0].mxu1 %v2168_v58  ;;  %v3843_v9 = vpack.i.bf16 %v4947_v35, %v4784_v21  ;;  %v1762_v29 = vrot.slane %v4792_v54, 2 }
 0x1a3   : > { %v3550_v40 = vpop.permute.xlu1 %3549  ;;  %3245 = vmatpush3.bf16.msra.mxu1 %v3935_v8  ;;  %v1726_v8 = vrot.slane %v4792_v54, 1 }
 0x1a4   : > { %v3552_v32 = vunpack.i.h.bf16 %v3550_v40  ;;  %v3551_v11 = vunpack.i.l.bf16 %v3550_v40  ;;  %3246 = vmatprep.subr.bf16.mxu1 %v3936_v49  ;;  %v1761_v49 = vrot.slane %v4798_v36, 2  ;;  %v3863_v40 = vpack.i.bf16 %v1537_v43, %v4947_v35 }
 0x1a5   : > { %3824 = vrot.lane.b32.xlu0 %v3823_v53, %s4033_s16  ;;  %v3942_v53 = vld [vmem:[%s5633_s3 + $0xe0] sm:$0xff]   ;;  %v1727_v43 = vsel %vm1185_vm6, %v1725_v51, %v1726_v8 }
 0x1a6   : > { %v4936_v10 = vsel %vm1634_vm9, %v1677_v17, %v3552_v32  ;;  %v4939_v13 = vsel %vm1634_vm9, %v1676_v31, %v3551_v11  ;;  %3849 = vrot.lane.b32.xlu1 %v3848_v23, %s4035_s26  ;;  %v3570_v6 = vpop.permute.xlu0 %3569  ;;  %v1763_v11 = vsel %vm1234_vm5, %v1761_v49, %v1762_v29  ;;  %v3943_v23 = vld [vmem:[%s5633_s3 + $0xa0] sm:$0xff]   ;;  %v3944_v17 = vld [vmem:[%s5633_s3 + $0xe8] sm:$0xff]   ;;  %v1834_v31 = vrot.slane %v4475_v62, 7 }
 0x1a7   : > { %v4942_v24 = vpop.permute.xlu1 %3554  ;;  %3247 = vmatpush3.bf16.msra.mxu1 %v3937_v45  ;;  %v3572_v19 = vunpack.i.h.bf16 %v3570_v6  ;;  %v3571_v30 = vunpack.i.l.bf16 %v3570_v6  ;;  %v3878_v6 = vpack.i.bf16 %v1726_v8, %v1727_v43 }
 0x1a8   : > { %3248 = vmatprep.subr.bf16.mxu1 %v3938_v22  ;;  %v3868_v22 = vpack.i.bf16 %v4792_v54, %v4798_v36 }
 0x1a9   : > { %3839 = vrot.lane.b32.xlu0 %v3838_v48, %s4035_s26  ;;  %v1700_v21 = vsel %vm982_vm4, %v4398_v60, %v3571_v30  ;;  %v1701_v37 = vsel %vm982_vm4, %v4462_v44, %v3572_v19  ;;  %v3853_v44 = vpack.i.bf16 %v4722_v2, %v4745_v15  ;;  %v3908_v2 = vpack.i.bf16 %v4748_v39, %v4760_v7 }
 0x1aa   : > { %3859 = vrot.lane.b32.xlu1 %v3858_v16, %s4034_s17  ;;  %v3575_v46 = vpop.permute.xlu0 %3574  ;;  %v3888_v48 = vpack.i.bf16 %v1762_v29, %v1763_v11  ;;  %v3556_v19 = vunpack.i.l.bf16 %v4942_v24 }
 0x1ab   : > { %v3577_v58 = vunpack.i.h.bf16 %v3575_v46  ;;  %v3576_v55 = vunpack.i.l.bf16 %v3575_v46  ;;  %v4963_v34 = vpop.permute.xlu1 %3559  ;;  %3249 = vmatpush3.bf16.msra.mxu1 %v3939_v28  ;;  %v3557_v28 = vunpack.i.h.bf16 %v4942_v24  ;;  %v1921_v46 = vrot.slane %v4840_v12, 2  ;;  %v3946_v24 = vld [vmem:[%s5633_s3 + $0xf0] sm:$0xff]  }
 0x1ac   : > { %3250 = vmatprep.subr.bf16.mxu1 %v3940_v42  ;;  %v1885_v42 = vrot.slane %v4840_v12, 1  ;;  %v3562_v29 = vunpack.i.h.bf16 %v4963_v34  ;;  %v3561_v49 = vunpack.i.l.bf16 %v4963_v34 }
 0x1ad   : > { %v1708_v50 = vsel %vm1634_vm9, %v1700_v21, %v3576_v55  ;;  %v1709_v45 = vsel %vm1634_vm9, %v1701_v37, %v3577_v58  ;;  %3844 = vrot.lane.b32.xlu0 %v3843_v9, %s4035_s26  ;;  %v3945_v9 = vld [vmem:[%s5633_s3 + $0xa8] sm:$0xff]   ;;  %v1884_v21 = vrot.slane %v4845_v59, 1 }
 0x1ae   : > { %3864 = vrot.lane.b32.xlu1 %v3863_v40, %s4033_s16 }
 0x1af   : > { %v4982_v32 = vpop.permute.xlu1 %3564  ;;  %v4984_v60 = vpop.permute.xlu0 %3584  ;;  %3251 = vmatpush3.bf16.msra.mxu1 %v3941_v5 }
 0x1b0   : > { %3252 = vmatprep.subr.bf16.mxu1 %v3942_v53  ;;  %v3587_v5 = vunpack.i.h.bf16 %v4984_v60 }
 0x1b1   : > { %3854 = vrot.lane.b32.xlu0 %v3853_v44, %s4035_s26  ;;  %v3586_v44 = vunpack.i.l.bf16 %v4984_v60  ;;  %v1628_v60 = vsel %vm982_vm4, %v4385_v47, %v3556_v19  ;;  %v1886_v19 = vsel %vm1185_vm6, %v1884_v21, %v1885_v42 }
 0x1b2   : > { %3869 = vrot.lane.b32.xlu1 %v3868_v22, %s4034_s17 }
 0x1b3   : > { %v3580_v30 = vpop.permute.xlu1 %3579  ;;  %v3590_v16 = vpop.permute.xlu0 %3589  ;;  %3253 = vmatpush3.bf16.msra.mxu1 %v3943_v23  ;;  %v3893_v23 = vpack.i.bf16 %v4840_v12, %v4845_v59 }
 0x1b4   : > { %v3582_v58 = vunpack.i.h.bf16 %v3580_v30  ;;  %v3581_v55 = vunpack.i.l.bf16 %v3580_v30  ;;  %v3592_v51 = vunpack.i.h.bf16 %v3590_v16  ;;  %v3591_v8 = vunpack.i.l.bf16 %v3590_v16  ;;  %3254 = vmatprep.subr.bf16.mxu1 %v3944_v17 }
 0x1b5   : > { %3874 = vrot.lane.b32.xlu0 %v3878_v6, %s4034_s17  ;;  %v1920_v17 = vrot.slane %v4845_v59, 2  ;;  %v1992_v30 = vsel %vm982_vm4, %v1834_v31, %v3587_v5 }
 0x1b6   : > { %v5020_v37 = vsel %vm1643_vm10, %v4936_v10, %v3582_v58  ;;  %v5024_v40 = vsel %vm1643_vm10, %v4939_v13, %v3581_v55  ;;  %3879 = vrot.lane.b32.xlu1 %v3878_v6, %s4033_s16  ;;  %v5028_v53 = vsel %vm1643_vm10, %v1708_v50, %v3591_v8  ;;  %v5031_v34 = vsel %vm1643_vm10, %v1709_v45, %v3592_v51  ;;  %v3947_v13 = vld [vmem:[%s5633_s3 + $0xb0] sm:$0xff]   ;;  %v3948_v6 = vld [vmem:[%s5633_s3 + $0xf8] sm:$0xff]  }
 0x1b7   : > { %v3595_v11 = vpop.permute.xlu1 %3594  ;;  %v3610_v10 = vpop.permute.xlu0 %3609  ;;  %3255 = vmatpush3.bf16.msra.mxu1 %v3945_v9  ;;  %v1629_v45 = vsel %vm982_vm4, %v4422_v20, %v3557_v28  ;;  %v1637_v20 = vsel %vm1634_vm9, %v1628_v60, %v3561_v49  ;;  %v3567_v55 = vunpack.i.h.bf16 %v4982_v32  ;;  %v3566_v51 = vunpack.i.l.bf16 %v4982_v32  ;;  %v3950_v32 = vld [vmem:[%s5633_s3 + $0x140] sm:$0xff]  }
 0x1b8   : > { %v3612_v22 = vunpack.i.h.bf16 %v3610_v10  ;;  %3256 = vmatprep.subr.bf16.mxu1 %v3946_v24  ;;  %v3597_v16 = vunpack.i.h.bf16 %v3595_v11  ;;  %v3596_v9 = vunpack.i.l.bf16 %v3595_v11  ;;  %v3611_v58 = vunpack.i.l.bf16 %v3610_v10 }
 0x1b9   : > { %3884 = vrot.lane.b32.xlu0 %v3888_v48, %s4033_s16  ;;  %v1638_v47 = vsel %vm1634_vm9, %v1629_v45, %v3562_v29  ;;  %v1655_v8 = vsel %vm982_vm4, %v4456_v41, %v3587_v5  ;;  %v1654_v24 = vsel %vm982_vm4, %v4407_v4, %v3586_v44  ;;  %v1922_v39 = vsel %vm1234_vm5, %v1920_v17, %v1921_v46 }
 0x1ba   : > { %v2008_v28 = vsel %vm1634_vm9, %v1992_v30, %v3612_v22  ;;  %3889 = vrot.lane.b32.xlu1 %v3888_v48, %s4035_s26  ;;  %v3949_v48 = vld [vmem:[%s5633_s3 + $0xb8] sm:$0xff]   ;;  %v1960_v41 = vsel %vm982_vm4, %v4472_v61, %v3597_v16  ;;  %v1959_v4 = vsel %vm982_vm4, %v4419_v18, %v3596_v9  ;;  %v1663_v5 = vsel %vm1634_vm9, %v1655_v8, %v3612_v22 }
 0x1bb   : > { %v3600_v49 = vpop.permute.xlu1 %3599  ;;  %v3615_v29 = vpop.permute.xlu0 %3614  ;;  %3257 = vmatpush3.bf16.msra.mxu1 %v3947_v13  ;;  %v1662_v44 = vsel %vm1634_vm9, %v1654_v24, %v3611_v58  ;;  %v1646_v16 = vsel %vm1643_vm10, %v1637_v20, %v3566_v51  ;;  %v1647_v9 = vsel %vm1643_vm10, %v1638_v47, %v3567_v55  ;;  %v1835_v47 = vrot.slane %v4514_v38, 7 }
 0x1bc   : > { %v3602_v11 = vunpack.i.h.bf16 %v3600_v49  ;;  %v3601_v10 = vunpack.i.l.bf16 %v3600_v49  ;;  %v3617_v21 = vunpack.i.h.bf16 %v3615_v29  ;;  %v3616_v45 = vunpack.i.l.bf16 %v3615_v29  ;;  %3258 = vmatprep.subr.bf16.mxu1 %v3948_v6 }
 0x1bd   : > { %3894 = vrot.lane.b32.xlu0 %v3893_v23, %s4034_s17  ;;  %v3898_v23 = vpack.i.bf16 %v1885_v42, %v1886_v19  ;;  %v2175_v20 = vpack.c.bf16 %v1647_v9, %v1646_v16  ;;  %v2072_v55 = vrot.slane %v1647_v9, 1  ;;  %v3903_v17 = vpack.i.bf16 %v1921_v46, %v1922_v39  ;;  %s4036_s17 = smov [#allocation4]  }
 0x1be   : > { %v1970_v13 = vsel %vm1634_vm9, %v1959_v4, %v3601_v10  ;;  %v1971_v60 = vsel %vm1634_vm9, %v1960_v41, %v3602_v11  ;;  %v2024_v6 = vsel %vm1643_vm10, %v2008_v28, %v3617_v21  ;;  %3909 = vrot.lane.b32.xlu1 %v3908_v2, %s4035_s26  ;;  %v1670_v61 = vsel %vm1643_vm10, %v1662_v44, %v3616_v45 }
 0x1bf   : > { %v3605_v18 = vpop.permute.xlu1 %3604  ;;  %v3625_v30 = vpop.permute.xlu0 %3624  ;;  %v1671_v22 = vsel %vm1643_vm10, %v1663_v5, %v3617_v21  ;;  %3259 = vmatpush3.bf16.msra.mxu1 %v3949_v48  ;;  %v3913_v41 = vpack.i.bf16 %v4801_v57, %v4824_v0 }
 0x1c0   : > { %v3607_v58 = vunpack.i.h.bf16 %v3605_v18  ;;  %v3606_v28 = vunpack.i.l.bf16 %v3605_v18  ;;  %3284 = vmatprep.subr.bf16.mxu1 %v3950_v32  ;;  %v3627_v7 = vunpack.i.h.bf16 %v3625_v30  ;;  %v3626_v2 = vunpack.i.l.bf16 %v3625_v30 }
 0x1c1   : > { %v2176_v8 = vpack.c.bf16 %v1671_v22, %v1670_v61  ;;  %3899 = vrot.lane.b32.xlu0 %v3898_v23, %s4033_s16 }
 0x1c2   : > { %v1981_v24 = vsel %vm1643_vm10, %v1970_v13, %v3606_v28  ;;  %v1982_v42 = vsel %vm1643_vm10, %v1971_v60, %v3607_v58  ;;  %v1993_v11 = vsel %vm982_vm4, %v1834_v31, %v3626_v2  ;;  %v1995_v10 = vsel %vm982_vm4, %v1835_v47, %v3627_v7 }
 0x1c3   : > { %v2073_v19 = vrot.slane %v1981_v24, 1  ;;  %2648 = vmatprep.mubr.bf16.mxu1 %v2176_v8  ;;  %v5101_v51 = vpop.permute.xlu1 %3619  ;;  %v3635_v49 = vpop.permute.xlu0 %3634  ;;  %v2075_v13 = vrot.slane %v2024_v6, 1  ;;  %v2082_v8 = vrot.slane %v1982_v42, 1 }
 0x1c4   : > { %2649 = vmatmul.mubr.bf16.gmra.mrb[4].mxu1 %v2175_v20  ;;  %v3637_v29 = vunpack.i.h.bf16 %v3635_v49  ;;  %v3636_v48 = vunpack.i.l.bf16 %v3635_v49 }
 0x1c5   : > { %v5110_v21 = vsel %vm1185_vm6, %v2072_v55, %v2073_v19  ;;  %3904 = vrot.lane.b32.xlu0 %v3903_v17, %s4035_s26  ;;  %v5659_v19 = vrot.slane %v4590_v1, 7 }
 0x1c6   : > { %v2009_v45 = vsel %vm1634_vm9, %v1993_v11, %v3636_v48  ;;  %v2011_v32 = vsel %vm1634_vm9, %v1995_v10, %v3637_v29 }
 0x1c7   : > { %v3640_v12 = vpop.permute.xlu0 %3639  ;;  %v5115_v46 = vpop.permute.xlu1 %3629 }
 0x1c8   : > { %v3642_v4 = vunpack.i.h.bf16 %v3640_v12  ;;  %v3641_v5 = vunpack.i.l.bf16 %v3640_v12 }
 0x1c9   : > { %3914 = vrot.lane.b32.xlu0 %v3913_v41, %s4035_s26  ;;  %s3972_s26 = sshll.u32 %s4036_s17, 4  ;;  %s3973_s26 = int_to_ptr.vmem [resolvable:$false] %s3972_s26 }
 0x1ca   : > { %v2025_v31 = vsel %vm1643_vm10, %v2009_v45, %v3641_v5  ;;  %v2027_v44 = vsel %vm1643_vm10, %v2011_v32, %v3642_v4  ;;  %s3974_s15 = scalar_lea.vmem %s3973_s26, 512  ;;  %p3975_p0 = scmp.lt.s32.totalorder %s5581_s10, %s3973_s26 }
 0x1cb   : > { %v2076_v60 = vrot.slane %v2025_v31, 1  ;;  %v5122_v61 = vpop.permute.xlu0 %3659  ;;  %v3645_v18 = vpop.permute.xlu1 %3644  ;;  %v2085_v12 = vrot.slane %v2027_v44, 1  ;;  %p3976_p1 = scmp.lt.s32.totalorder %s3974_s15, %s3968_s14 }
 0x1cc   : > { %v3646_v57 = vunpack.i.l.bf16 %v3645_v18  ;;  %v3647_v29 = vunpack.i.h.bf16 %v3645_v18 }
 0x1cd   : > { %v5125_v30 = vsel %vm1185_vm6, %v2075_v13, %v2076_v60  ;;  %p3977_p2 = por %p3976_p1, %p3975_p0 }
 0x1ce   : > { %v1630_v28 = vsel %vm982_vm4, %v4475_v62, %v3646_v57  ;;  %v1631_v31 = vsel %vm982_vm4, %v4514_v38, %v3647_v29 }
 0x1cf   : > { %v5127_v22 = vpop.permute.xlu0 %3664  ;;  %v3650_v23 = vpop.permute.xlu1 %3649  ;;  %p3978_p3 = pnand %p3977_p2, %p3971_p13 }
 0x1d0   : > { %v3651_v0 = vunpack.i.l.bf16 %v3650_v23  ;;  %v3652_v11 = vunpack.i.h.bf16 %v3650_v23 }
 0x1d2   : > { %v1639_v6 = vsel %vm1634_vm9, %v1630_v28, %v3651_v0  ;;  %v1640_v23 = vsel %vm1634_vm9, %v1631_v31, %v3652_v11 }
 0x1d3   : > { %v3655_v16 = vpop.permute.xlu1 %3654  ;;  %v3675_v9 = vpop.permute.xlu0 %3674 }
 0x1d4   : > { %v3656_v58 = vunpack.i.l.bf16 %v3655_v16  ;;  %v3677_v24 = vunpack.i.h.bf16 %v3675_v9  ;;  %v3676_v62 = vunpack.i.l.bf16 %v3675_v9  ;;  %v3657_v41 = vunpack.i.h.bf16 %v3655_v16 }
 0x1d6   : > { %v1648_v2 = vsel %vm1643_vm10, %v1639_v6, %v3656_v58  ;;  %v1996_v10 = vsel %vm982_vm4, %v5659_v19, %v3677_v24  ;;  %v1994_v13 = vsel %vm982_vm4, %v1835_v47, %v3676_v62  ;;  %v1657_v57 = vsel %vm982_vm4, %v4600_v56, %v3677_v24 }
 0x1d7   : > { %v5132_v39 = vpop.permute.xlu1 %3669  ;;  %v5134_v7 = vpop.permute.xlu0 %3679  ;;  %v2081_v20 = vrot.slane %v1648_v2, 1  ;;  %v1656_v0 = vsel %vm982_vm4, %v4551_v3, %v3676_v62 }
 0x1d9   : > { %v5139_v17 = vsel %vm1185_vm6, %v2081_v20, %v2082_v8  ;;  %v5171_v8 = vsel %vm1643_vm10, %v1640_v23, %v3657_v41 }
 0x1db   : > { %v3685_v55 = vpop.permute.xlu1 %3684  ;;  %v3690_v49 = vpop.permute.xlu0 %3689 }
 0x1dc   : > { %v3692_v48 = vunpack.i.h.bf16 %v3690_v49  ;;  %v3691_v45 = vunpack.i.l.bf16 %v3690_v49  ;;  %v2182_v49 = vpack.c.bf16 %v5171_v8, %v1648_v2  ;;  %v3686_v2 = vunpack.i.l.bf16 %v3685_v55 }
 0x1de   : > { %v2012_v32 = vsel %vm1634_vm9, %v1996_v10, %v3692_v48  ;;  %v2010_v44 = vsel %vm1634_vm9, %v1994_v13, %v3691_v45  ;;  %v1665_v16 = vsel %vm1634_vm9, %v1657_v57, %v3692_v48  ;;  %v1664_v9 = vsel %vm1634_vm9, %v1656_v0, %v3691_v45 }
 0x1df   : > { %v5147_v4 = vpop.permute.xlu1 %3699  ;;  %v3695_v5 = vpop.permute.xlu0 %3694 }
 0x1e0   : > { %v3697_v60 = vunpack.i.h.bf16 %v3695_v5  ;;  %v3696_v18 = vunpack.i.l.bf16 %v3695_v5  ;;  %v3687_v5 = vunpack.i.h.bf16 %v3685_v55 }
 0x1e2   : > { %v2026_v38 = vsel %vm1643_vm10, %v2010_v44, %v3696_v18  ;;  %v5162_v47 = vsel %vm1643_vm10, %v2012_v32, %v3697_v60  ;;  %v1672_v56 = vsel %vm1643_vm10, %v1664_v9, %v3696_v18  ;;  %v1673_v3 = vsel %vm1643_vm10, %v1665_v16, %v3697_v60 }
 0x1e3   : > { %v2084_v58 = vrot.slane %v2026_v38, 1  ;;  %v5164_v28 = vpop.permute.xlu0 %3704  ;;  %v5166_v6 = vpop.permute.xlu1 %3709  ;;  %v2183_v24 = vpack.c.bf16 %v1673_v3, %v1672_v56  ;;  %v1962_v44 = vsel %vm982_vm4, %v4597_v52, %v3687_v5  ;;  %v1961_v16 = vsel %vm982_vm4, %v4511_v33, %v3686_v2 }
 0x1e4   : > { %v1837_v9 = vrot.slane %v4621_v25, 7  ;;  %v2090_v38 = vrot.slane %v5171_v8, 1  ;;  %v3707_v55 = vunpack.i.h.bf16 %v5164_v28 }
 0x1e5   : > { %v5174_v20 = vsel %vm1185_vm6, %v2084_v58, %v2085_v12  ;;  %2656 = vmatprep.mubr.bf16.mxu1 %v2183_v24 }
 0x1e6   : > { %2657 = vmatmul.mubr.bf16.gmra.mrb[8].mxu1 %v2182_v49 }
 0x1e7   : > { %v5177_v29 = vpop.permute.xlu0 %3729  ;;  %v3715_v62 = vpop.permute.xlu1 %3714 }
 0x1e8   : > { %v3716_v31 = vunpack.i.l.bf16 %v3715_v62  ;;  %v3717_v13 = vunpack.i.h.bf16 %v3715_v62  ;;  %v3706_v62 = vunpack.i.l.bf16 %v5164_v28 }
 0x1ea   : > { %v1632_v58 = vsel %vm982_vm4, %v4590_v1, %v3716_v31  ;;  %v1633_v24 = vsel %vm982_vm4, %v4621_v25, %v3717_v13 }
 0x1eb   : > { %v5181_v11 = vpop.permute.xlu0 %3734  ;;  %v3720_v10 = vpop.permute.xlu1 %3719 }
 0x1ec   : > { %v3721_v60 = vunpack.i.l.bf16 %v3720_v10  ;;  %v3722_v18 = vunpack.i.h.bf16 %v3720_v10 }
 0x1ee   : > { %v1641_v49 = vsel %vm1634_vm9, %v1632_v58, %v3721_v60  ;;  %v1642_v8 = vsel %vm1634_vm9, %v1633_v24, %v3722_v18 }
 0x1ef   : > { %v3725_v45 = vpop.permute.xlu1 %3724  ;;  %v5183_v32 = vpop.permute.xlu0 %3744 }
 0x1f0   : > { %v3726_v23 = vunpack.i.l.bf16 %v3725_v45  ;;  %v5658_v52 = vunpack.i.h.bf16 %v5183_v32  ;;  %v3746_v33 = vunpack.i.l.bf16 %v5183_v32  ;;  %v3727_v10 = vunpack.i.h.bf16 %v3725_v45  ;;  %v5683_v45 = vld [vmem:[#allocation23_spill] sm:$0xff] }
 0x1f2   : > { %v1650_v31 = vsel %vm1643_vm10, %v1641_v49, %v3726_v23  ;;  %v1659_v24 = vsel %vm982_vm4, %v5683_v45, %v5658_v52  ;;  %v5684_v23 = vld [vmem:[#allocation19_spill] sm:$0xff] }
 0x1f3   : > { %v5185_v41 = vpop.permute.xlu1 %3739  ;;  %v5187_v12 = vpop.permute.xlu0 %3749  ;;  %v1658_v49 = vsel %vm982_vm4, %v5684_v23, %v3746_v33  ;;  %v2099_v50 = vrot.slane %v1650_v31, 1 }
 0x1f7   : > { %v3770_v57 = vpop.permute.xlu1 %3769  ;;  %v5189_v0 = vpop.permute.xlu0 %3754 }
 0x1f8   : > { %v3772_v56 = vunpack.i.h.bf16 %v3770_v57  ;;  %v3771_v3 = vunpack.i.l.bf16 %v3770_v57  ;;  %v3757_v57 = vunpack.i.h.bf16 %v5189_v0  ;;  %v3756_v25 = vunpack.i.l.bf16 %v5189_v0 }
 0x1fa   : > { %v1973_v58 = vsel %vm1634_vm9, %v1962_v44, %v3772_v56  ;;  %v1972_v42 = vsel %vm1634_vm9, %v1961_v16, %v3771_v3  ;;  %v5227_v3 = vsel %vm1643_vm10, %v1642_v8, %v3727_v10  ;;  %v1667_v45 = vsel %vm1634_vm9, %v1659_v24, %v3757_v57 }
 0x1fb   : > { %v3780_v5 = vpop.permute.xlu1 %3779  ;;  %v5207_v2 = vpop.permute.xlu0 %3759  ;;  %v1666_v52 = vsel %vm1634_vm9, %v1658_v49, %v3756_v25  ;;  %v3662_v10 = vunpack.i.h.bf16 %v5122_v61  ;;  %v1999_v49 = vsel %vm982_vm4, %v1837_v9, %v3707_v55 }
 0x1fc   : > { %v3782_v13 = vunpack.i.h.bf16 %v3780_v5  ;;  %v3781_v60 = vunpack.i.l.bf16 %v3780_v5  ;;  %v3762_v28 = vunpack.i.h.bf16 %v5207_v2  ;;  %v3761_v18 = vunpack.i.l.bf16 %v5207_v2 }
 0x1fe   : > { %v1983_v48 = vsel %vm1643_vm10, %v1972_v42, %v3781_v60  ;;  %v1984_v5 = vsel %vm1643_vm10, %v1973_v58, %v3782_v13  ;;  %v1674_v42 = vsel %vm1643_vm10, %v1666_v52, %v3761_v18  ;;  %v3661_v60 = vunpack.i.l.bf16 %v5122_v61 }
 0x1ff   : > { %v2091_v43 = vrot.slane %v1983_v48, 1  ;;  %v2100_v44 = vrot.slane %v1984_v5, 1  ;;  %v5224_v56 = vpop.permute.xlu1 %3784  ;;  %v3765_v16 = vpop.permute.xlu0 %3764  ;;  %v1675_v48 = vsel %vm1643_vm10, %v1667_v45, %v3762_v28  ;;  %v5685_v58 = vrot.slane %v4590_v1, 7 }
 0x200   : > { %v3767_v23 = vunpack.i.h.bf16 %v3765_v16  ;;  %v3766_v19 = vunpack.i.l.bf16 %v3765_v16  ;;  %v1998_v52 = vsel %vm982_vm4, %v1837_v9, %v3746_v33  ;;  %v2190_v16 = vpack.c.bf16 %v1675_v48, %v1674_v42 }
 0x201   : > { %v5238_v13 = vsel %vm1185_vm6, %v2090_v38, %v2091_v43  ;;  %v5241_v8 = vsel %vm1185_vm6, %v2099_v50, %v2100_v44  ;;  %v1997_v24 = vsel %vm982_vm4, %v5685_v58, %v3706_v62  ;;  %v2014_v5 = vsel %vm1634_vm9, %v1998_v52, %v3756_v25 }
 0x202   : > { %v2179_v50 = vpack.c.bf16 %v5241_v8, %v5238_v13  ;;  %v2030_v44 = vsel %vm1643_vm10, %v2014_v5, %v3761_v18  ;;  %v2189_v61 = vpack.c.bf16 %v5227_v3, %v1650_v31  ;;  %v3667_v62 = vunpack.i.h.bf16 %v5127_v22  ;;  %2664 = vmatprep.mubr.bf16.mxu1 %v2190_v16 }
 0x203   : > { %v5251_v43 = vpop.permute.xlu1 %3794  ;;  %v3775_v38 = vpop.permute.xlu0 %3774  ;;  %v3666_v33 = vunpack.i.l.bf16 %v5127_v22  ;;  %v2015_v9 = vsel %vm1634_vm9, %v1999_v49, %v3767_v23  ;;  %v2013_v55 = vsel %vm1634_vm9, %v1997_v24, %v3766_v19  ;;  %v3682_v25 = vunpack.i.h.bf16 %v5134_v7  ;;  %v5687_v24 = vld [vmem:[#allocation8_spill] sm:$0xff]  ;;  %v5688_v49 = vld [vmem:[#allocation13_spill] sm:$0xff] }
 0x204   : > { %v3777_v1 = vunpack.i.h.bf16 %v3775_v38  ;;  %v3776_v45 = vunpack.i.l.bf16 %v3775_v38  ;;  %v3681_v42 = vunpack.i.l.bf16 %v5134_v7  ;;  %2665 = vmatmul.mubr.bf16.gmra.mrb[12].mxu1 %v2189_v61  ;;  %v2093_v48 = vrot.slane %v5162_v47, 1 }
 0x205   : > { %v2102_v58 = vrot.slane %v2030_v44, 1  ;;  %v5686_v22 = vpack.c.bf16 %v5031_v34, %v5028_v53  ;;  %v1702_v7 = vsel %vm982_vm4, %v5687_v24, %v3661_v60  ;;  %v1703_v16 = vsel %vm982_vm4, %v5688_v49, %v3662_v10 }
 0x206   : > { %v2029_v18 = vsel %vm1643_vm10, %v2013_v55, %v3776_v45  ;;  %v2031_v31 = vsel %vm1643_vm10, %v2015_v9, %v3777_v1  ;;  %v1710_v38 = vsel %vm1634_vm9, %v1702_v7, %v3666_v33  ;;  %v1711_v47 = vsel %vm1634_vm9, %v1703_v16, %v3667_v62  ;;  %v3951_v62 = vld [vmem:[%s5633_s3 + $0x100] sm:$0xff]  }
 0x207   : > { %v2094_v52 = vrot.slane %v2029_v18, 1  ;;  %v2103_v5 = vrot.slane %v2031_v31, 1  ;;  %2705 = vmatprep.mubr.bf16.mxu1 %v5686_v22  ;;  %v5269_v19 = vpop.permute.xlu0 %3789  ;;  %v5271_v23 = vpop.permute.xlu1 %3799  ;;  %v3622_v34 = vunpack.i.h.bf16 %v5101_v51  ;;  %v3621_v61 = vunpack.i.l.bf16 %v5101_v51  ;;  %v5690_v22 = vld [vmem:[#allocation9_spill] sm:$0xff] }
 0x208   : > { %v1718_v1 = vsel %vm1643_vm10, %v1710_v38, %v3681_v42  ;;  %v1719_v60 = vsel %vm1643_vm10, %v1711_v47, %v3682_v25  ;;  %v3632_v10 = vunpack.i.h.bf16 %v5115_v46  ;;  %v3631_v45 = vunpack.i.l.bf16 %v5115_v46  ;;  %v3952_v46 = vld [vmem:[%s5633_s3 + $0x148] sm:$0xff]  }
 0x209   : > { %v5280_v44 = vsel %vm1185_vm6, %v2093_v48, %v2094_v52  ;;  %v5283_v53 = vsel %vm1185_vm6, %v2102_v58, %v2103_v5  ;;  %v3672_v51 = vunpack.i.h.bf16 %v5132_v39  ;;  %v3671_v42 = vunpack.i.l.bf16 %v5132_v39  ;;  %v5689_v52 = vld [vmem:[#allocation7_spill] sm:$0xff] }
 0x20a   : > { %v2180_v55 = vpack.c.bf16 %v5283_v53, %v5280_v44  ;;  %v3732_v25 = vunpack.i.h.bf16 %v5177_v29  ;;  %v3731_v18 = vunpack.i.l.bf16 %v5177_v29  ;;  %v3737_v31 = vunpack.i.h.bf16 %v5181_v11 }
 0x20b   : > { %v5294_v33 = vpop.permute.xlu0 %3809  ;;  %v5296_v9 = vpop.permute.xlu1 %3804  ;;  %v3736_v48 = vunpack.i.l.bf16 %v5181_v11  ;;  %v2178_v58 = vpack.c.bf16 %v1719_v60, %v1718_v1  ;;  %v1678_v5 = vsel %vm982_vm4, %v5689_v52, %v3621_v61  ;;  %v1679_v24 = vsel %vm982_vm4, %v5690_v22, %v3622_v34  ;;  %v3953_v11 = vld [vmem:[%s5633_s3 + $0x108] sm:$0xff]   ;;  %v3954_v60 = vld [vmem:[%s5633_s3 + $0x150] sm:$0xff]   ;;  %v5694_v22 = vld [vmem:[#allocation10_spill] sm:$0xff] }
 0x20c   : > { %v3752_v39 = vunpack.i.h.bf16 %v5187_v12  ;;  %v3751_v7 = vunpack.i.l.bf16 %v5187_v12  ;;  %v5691_v29 = vpack.c.bf16 %v5020_v37, %v5024_v40  ;;  %v1687_v49 = vsel %vm1634_vm9, %v1679_v24, %v3632_v10  ;;  %v5692_v34 = vld [vmem:[#allocation20_spill] sm:$0xff] }
 0x20d   : > { %v1686_v16 = vsel %vm1634_vm9, %v1678_v5, %v3631_v45  ;;  %v1704_v12 = vsel %vm982_vm4, %v5692_v34, %v3731_v18  ;;  %v5693_v61 = vld [vmem:[#allocation24_spill] sm:$0xff]  ;;  %v1695_v1 = vsel %vm1643_vm10, %v1687_v49, %v3672_v51  ;;  %v3702_v10 = vunpack.i.h.bf16 %v5147_v4 }
 0x20e   : > { %2706 = vmatmul.mubr.bf16.vlgmr.msra.gmra.mrb[16].mxu1 %v5691_v29  ;;  %v1705_v37 = vsel %vm982_vm4, %v5693_v61, %v3732_v25  ;;  %v1694_v40 = vsel %vm1643_vm10, %v1686_v16, %v3671_v42  ;;  %v3701_v45 = vunpack.i.l.bf16 %v5147_v4  ;;  %v3711_v25 = vunpack.i.l.bf16 %v5166_v6  ;;  %v3955_v4 = vld [vmem:[%s5633_s3 + $0x110] sm:$0xff]   ;;  %v3957_v16 = vld [vmem:[%s5633_s3 + $0x118] sm:$0xff]  }
 0x20f   : > { %2713 = vmatprep.mubr.bf16.mxu1 %v2178_v58  ;;  %3285 = vmatpush3.bf16.msra.mxu1 %v3951_v62  ;;  %v5323_v38 = vpop.permute.xlu0 %3814  ;;  %v5325_v47 = vpop.permute.xlu1 %3829  ;;  %v1712_v62 = vsel %vm1634_vm9, %v1704_v12, %v3736_v48  ;;  %v1713_v18 = vsel %vm1634_vm9, %v1705_v37, %v3737_v31  ;;  %v3712_v58 = vunpack.i.h.bf16 %v5166_v6  ;;  %v3741_v52 = vunpack.i.l.bf16 %v5185_v41  ;;  %v3956_v6 = vld [vmem:[%s5633_s3 + $0x158] sm:$0xff]  }
 0x210   : > { %3286 = vmatprep.subr.bf16.mxu1 %v3952_v46  ;;  %v1720_v42 = vsel %vm1643_vm10, %v1712_v62, %v3751_v7  ;;  %v1721_v51 = vsel %vm1643_vm10, %v1713_v18, %v3752_v39  ;;  %v3742_v46 = vunpack.i.h.bf16 %v5185_v41  ;;  %v2177_v5 = vpack.c.bf16 %v1695_v1, %v1694_v40  ;;  %v5695_v39 = vld [vmem:[#allocation15_spill] sm:$0xff] }
 0x211   : > { %v1680_v24 = vsel %vm982_vm4, %v5694_v22, %v3701_v45  ;;  %v1681_v41 = vsel %vm982_vm4, %v5695_v39, %v3702_v10  ;;  %v2185_v7 = vpack.c.bf16 %v1721_v51, %v1720_v42  ;;  %v3958_v1 = vld [vmem:[%s5633_s3 + $0x160] sm:$0xff]   ;;  %v3787_v62 = vunpack.i.h.bf16 %v5224_v56 }
 0x212   : > { %v1689_v29 = vsel %vm1634_vm9, %v1681_v41, %v3712_v58  ;;  %v1688_v49 = vsel %vm1634_vm9, %v1680_v24, %v3711_v25  ;;  %v3786_v18 = vunpack.i.l.bf16 %v5224_v56  ;;  %v3807_v58 = vunpack.i.h.bf16 %v5296_v9  ;;  %v3959_v42 = vld [vmem:[%s5633_s3 + $0x120] sm:$0xff]  }
 0x213   : > { %3287 = vmatpush3.bf16.msra.mxu1 %v3953_v11  ;;  %v3820_v48 = vpop.permute.xlu0 %3819  ;;  %v1696_v34 = vsel %vm1643_vm10, %v1688_v49, %v3741_v52  ;;  %v1697_v12 = vsel %vm1643_vm10, %v1689_v29, %v3742_v46  ;;  %v3806_v25 = vunpack.i.l.bf16 %v5296_v9  ;;  %v5696_v46 = vld [vmem:[#allocation27_spill] sm:$0xff]  ;;  %v3960_v9 = vld [vmem:[%s5633_s3 + $0x168] sm:$0xff]   ;;  %v3831_v22 = vunpack.i.l.bf16 %v5325_v47 }
 0x214   : > { %3288 = vmatprep.subr.bf16.mxu1 %v3954_v60  ;;  %v5349_v31 = vpop.permute.xlu1 %3834  ;;  %v3822_v61 = vunpack.i.h.bf16 %v3820_v48  ;;  %v3821_v37 = vunpack.i.l.bf16 %v3820_v48  ;;  %v2184_v45 = vpack.c.bf16 %v1697_v12, %v1696_v34  ;;  %v1683_v49 = vsel %vm982_vm4, %v4745_v15, %v3787_v62 }
 0x215   : > { %v1691_v34 = vsel %vm1634_vm9, %v1683_v49, %v3807_v58  ;;  %v1839_v62 = vrot.slane %v4738_v14, 7  ;;  %v3811_v58 = vunpack.i.l.bf16 %v5294_v33  ;;  %v3796_v2 = vunpack.i.l.bf16 %v5251_v43 }
 0x216   : > { %2714 = vmatmul.mubr.bf16.gmra.mrb[20].mxu1 %v2177_v5  ;;  %v1706_v52 = vsel %vm982_vm4, %v5696_v46, %v3821_v37  ;;  %v3962_v37 = vld [vmem:[%s5633_s3 + $0x170] sm:$0xff]   ;;  %v3836_v46 = vunpack.i.l.bf16 %v5349_v31 }
 0x217   : > { %2721 = vmatprep.mubr.bf16.mxu1 %v2185_v7  ;;  %3289 = vmatpush3.bf16.msra.mxu1 %v3955_v4  ;;  %v3825_v11 = vpop.permute.xlu0 %3824  ;;  %v1707_v4 = vsel %vm982_vm4, %v4947_v35, %v3822_v61  ;;  %v5697_v7 = vld [vmem:[#allocation16_spill] sm:$0xff] }
 0x218   : > { %3290 = vmatprep.subr.bf16.mxu1 %v3956_v6  ;;  %v5365_v40 = vpop.permute.xlu1 %3849  ;;  %v3827_v60 = vunpack.i.h.bf16 %v3825_v11  ;;  %v3826_v10 = vunpack.i.l.bf16 %v3825_v11  ;;  %v3832_v6 = vunpack.i.h.bf16 %v5325_v47  ;;  %v1682_v29 = vsel %vm982_vm4, %v5697_v7, %v3786_v18  ;;  %v3961_v47 = vld [vmem:[%s5633_s3 + $0x128] sm:$0xff]  }
 0x219   : > { %v1690_v12 = vsel %vm1634_vm9, %v1682_v29, %v3806_v25  ;;  %v3812_v18 = vunpack.i.h.bf16 %v5294_v33  ;;  %v3801_v25 = vunpack.i.l.bf16 %v5271_v23  ;;  %v3851_v49 = vunpack.i.l.bf16 %v5365_v40 }
 0x21a   : > { %v1714_v24 = vsel %vm1634_vm9, %v1706_v52, %v3826_v10  ;;  %v1715_v39 = vsel %vm1634_vm9, %v1707_v4, %v3827_v60  ;;  %v1698_v60 = vsel %vm1643_vm10, %v1690_v12, %v3831_v22  ;;  %v1699_v10 = vsel %vm1643_vm10, %v1691_v34, %v3832_v6  ;;  %v3963_v52 = vld [vmem:[%s5633_s3 + $0x130] sm:$0xff]   ;;  %v3964_v6 = vld [vmem:[%s5633_s3 + $0x178] sm:$0xff]  }
 0x21b   : > { %3291 = vmatpush3.bf16.msra.mxu1 %v3957_v16  ;;  %v3840_v51 = vpop.permute.xlu0 %3839  ;;  %v2191_v33 = vpack.c.bf16 %v1699_v10, %v1698_v60  ;;  %v2002_v29 = vsel %vm982_vm4, %v1839_v62, %v3812_v18  ;;  %v3965_v34 = vld [vmem:[%s5633_s3 + $0x138] sm:$0xff]   ;;  %v2108_v10 = vrot.slane %v5227_v3, 1 }
 0x21c   : > { %3292 = vmatprep.subr.bf16.mxu1 %v3958_v1  ;;  %v5381_v48 = vpop.permute.xlu1 %3859  ;;  %v3842_v56 = vunpack.i.h.bf16 %v3840_v51  ;;  %v3841_v5 = vunpack.i.l.bf16 %v3840_v51  ;;  %v5698_v1 = vld [vmem:[#allocation21_spill] sm:$0xff]  ;;  %v3837_v51 = vunpack.i.h.bf16 %v5349_v31  ;;  %v5699_v31 = vunpack.i.h.bf16 %v5183_v32 }
 0x21d   : > { %v1838_v15 = vrot.slane %v5698_v1, 7 }
 0x21e   : > { %2722 = vmatmul.mubr.bf16.gmra.mrb[24].mxu1 %v2184_v45  ;;  %v1722_v35 = vsel %vm1643_vm10, %v1714_v24, %v3841_v5  ;;  %v1723_v41 = vsel %vm1643_vm10, %v1715_v39, %v3842_v56  ;;  %v3802_v45 = vunpack.i.h.bf16 %v5271_v23  ;;  %v3852_v56 = vunpack.i.h.bf16 %v5365_v40 }
 0x21f   : > { %3293 = vmatpush3.bf16.msra.mxu1 %v3959_v42  ;;  %v3845_v16 = vpop.permute.xlu0 %3844  ;;  %v2192_v11 = vpack.c.bf16 %v1723_v41, %v1722_v35  ;;  %v3817_v42 = vunpack.i.h.bf16 %v5323_v38  ;;  %v2000_v22 = vsel %vm982_vm4, %v1838_v15, %v5699_v31  ;;  %v3792_v24 = vunpack.i.h.bf16 %v5269_v19  ;;  %v5700_v35 = vld [vmem:[#allocation14_spill] sm:$0xff] }
 0x220   : > { %3294 = vmatprep.subr.bf16.mxu1 %v3960_v9  ;;  %v5401_v61 = vpop.permute.xlu1 %3864  ;;  %v3847_v5 = vunpack.i.h.bf16 %v3845_v16  ;;  %v3846_v9 = vunpack.i.l.bf16 %v3845_v16  ;;  %v3816_v39 = vunpack.i.l.bf16 %v5323_v38  ;;  %v1963_v41 = vsel %vm982_vm4, %v5700_v35, %v3802_v45 }
 0x221   : > { %2729 = vmatprep.mubr.bf16.mxu1 %v2192_v11  ;;  %v2001_v7 = vsel %vm982_vm4, %v1838_v15, %v3811_v58  ;;  %v1974_v32 = vsel %vm1634_vm9, %v1963_v41, %v3817_v42  ;;  %v2018_v16 = vsel %vm1634_vm9, %v2002_v29, %v3837_v51  ;;  %v5701_v38 = vpack.c.bf16 %v5174_v20, %v5125_v30  ;;  %v3966_v30 = vld [vmem:[%s5633_s3 + $0x180] sm:$0xff]  }
 0x222   : > { %v2017_v11 = vsel %vm1634_vm9, %v2001_v7, %v3836_v46  ;;  %v2003_v40 = vsel %vm982_vm4, %v1839_v62, %v3801_v25  ;;  %v2016_v20 = vsel %vm1634_vm9, %v2000_v22, %v3757_v57  ;;  %v1840_v62 = vrot.slane %v4798_v36, 7  ;;  %v5702_v25 = vld [vmem:[#allocation22_spill] sm:$0xff] }
 0x223   : > { %3295 = vmatpush3.bf16.msra.mxu1 %v3961_v47  ;;  %v5420_v4 = vpop.permute.xlu0 %3854  ;;  %v3791_v47 = vunpack.i.l.bf16 %v5269_v19  ;;  %v1985_v19 = vsel %vm1643_vm10, %v1974_v32, %v3852_v56  ;;  %v2033_v15 = vsel %vm1643_vm10, %v2017_v11, %v3846_v9  ;;  %v2019_v45 = vsel %vm1634_vm9, %v2003_v40, %v3816_v39  ;;  %v3967_v9 = vld [vmem:[%s5633_s3 + $0x188] sm:$0xff]  }
 0x224   : > { %3296 = vmatprep.subr.bf16.mxu1 %v3962_v37  ;;  %v5423_v23 = vpop.permute.xlu1 %3869  ;;  %v2034_v37 = vsel %vm1643_vm10, %v2018_v16, %v3847_v5  ;;  %v2032_v18 = vsel %vm1643_vm10, %v2016_v20, %v3762_v28  ;;  %v3797_v58 = vunpack.i.h.bf16 %v5251_v43  ;;  %v1965_v42 = vsel %vm982_vm4, %v5702_v25, %v3792_v24 }
 0x225   : > { %v2035_v51 = vsel %vm1643_vm10, %v2019_v45, %v3851_v49  ;;  %v1964_v0 = vsel %vm982_vm4, %v5698_v1, %v3791_v47  ;;  %v2109_v57 = vrot.slane %v1985_v19, 1  ;;  %v2120_v3 = vrot.slane %v2034_v37, 1 }
 0x226   : > { %2730 = vmatmul.mubr.bf16.gmra.mrb[28].mxu1 %v2191_v33  ;;  %v2112_v46 = vrot.slane %v2033_v15, 1  ;;  %v3861_v28 = vunpack.i.l.bf16 %v5381_v48  ;;  %v3857_v56 = vunpack.i.h.bf16 %v5420_v4  ;;  %v3856_v5 = vunpack.i.l.bf16 %v5420_v4 }
 0x227   : > { %3297 = vmatpush3.bf16.msra.mxu1 %v3963_v52  ;;  %2770 = vmatprep.mubr.bf16.mxu1 %v5701_v38  ;;  %v5448_v12 = vpop.permute.xlu0 %3874  ;;  %v2111_v1 = vrot.slane %v2032_v18, 1  ;;  %v2121_v33 = vrot.slane %v2035_v51, 1  ;;  %v3866_v31 = vunpack.i.l.bf16 %v5401_v61  ;;  %v3867_v43 = vunpack.i.h.bf16 %v5401_v61 }
 0x228   : > { %3298 = vmatprep.subr.bf16.mxu1 %v3964_v6  ;;  %v5454_v60 = vpop.permute.xlu1 %3879  ;;  %v3862_v6 = vunpack.i.h.bf16 %v5381_v48  ;;  %v1975_v24 = vsel %vm1634_vm9, %v1964_v0, %v3796_v2  ;;  %v1976_v39 = vsel %vm1634_vm9, %v1965_v42, %v3797_v58  ;;  %v5703_v4 = vpack.c.bf16 %v5139_v17, %v5110_v21 }
 0x229   : > { %v1841_v35 = vrot.slane %v4845_v59, 7  ;;  %v3871_v41 = vunpack.i.l.bf16 %v5423_v23  ;;  %v2113_v61 = vsel %vm1185_vm6, %v2111_v1, %v2112_v46  ;;  %v2122_v7 = vsel %vm1185_vm6, %v2120_v3, %v2121_v33 }
 0x22a   : > { %v5499_v29 = vsel %vm1185_vm6, %v2108_v10, %v2109_v57  ;;  %v1966_v21 = vsel %vm982_vm4, %v4738_v14, %v3861_v28  ;;  %v3872_v59 = vunpack.i.h.bf16 %v5423_v23  ;;  %v1987_v17 = vsel %vm1643_vm10, %v1976_v39, %v3857_v56 }
 0x22b   : > { %3299 = vmatpush3.bf16.msra.mxu1 %v3965_v34  ;;  %v5474_v52 = vpop.permute.xlu0 %3884  ;;  %v1986_v49 = vsel %vm1643_vm10, %v1975_v24, %v3856_v5  ;;  %v1967_v44 = vsel %vm982_vm4, %v4735_v63, %v3862_v6  ;;  %v1977_v53 = vsel %vm1634_vm9, %v1966_v21, %v3866_v31  ;;  %v3881_v47 = vunpack.i.l.bf16 %v5454_v60 }
 0x22c   : > { %3446 = vmatprep.subr.bf16.mxu1 %v3966_v30  ;;  %v3890_v22 = vpop.permute.xlu1 %3889  ;;  %v1978_v32 = vsel %vm1634_vm9, %v1967_v44, %v3867_v43  ;;  %v2187_v11 = vpack.c.bf16 %v2122_v7, %v2113_v61  ;;  %v2004_v23 = vsel %vm982_vm4, %v1840_v62, %v3871_v41  ;;  %v2118_v38 = vrot.slane %v1987_v17, 1 }
 0x22d   : > { %v3892_v16 = vunpack.i.h.bf16 %v3890_v22  ;;  %v3891_v14 = vunpack.i.l.bf16 %v3890_v22  ;;  %v2117_v34 = vrot.slane %v1986_v49, 1  ;;  %v3877_v40 = vunpack.i.h.bf16 %v5448_v12 }
 0x22e   : > { %2771 = vmatmul.mubr.bf16.vlgmr.msra.gmra.mrb[32].mxu1 %v5703_v4  ;;  %v2005_v63 = vsel %vm982_vm4, %v1840_v62, %v3872_v59  ;;  %v3876_v15 = vunpack.i.l.bf16 %v5448_v12  ;;  %v2020_v10 = vsel %vm1634_vm9, %v2004_v23, %v3881_v47  ;;  %v3887_v62 = vunpack.i.h.bf16 %v5474_v52  ;;  %v5705_v47 = vld [vmem:[#allocation11_spill] sm:$0xff]  ;;  %v5710_v23 = vld [vmem:[#allocation26_spill] sm:$0xff] }
 0x22f   : > { %2778 = vmatprep.mubr.bf16.mxu1 %v2180_v55  ;;  %3447 = vmatpush3.bf16.msra.mxu1 %v3966_v30  ;;  %v3895_v48 = vpop.permute.xlu0 %3894  ;;  %v3882_v55 = vunpack.i.h.bf16 %v5454_v60  ;;  %v2036_v58 = vsel %vm1643_vm10, %v2020_v10, %v3891_v14  ;;  %v1969_v12 = vsel %vm982_vm4, %v4792_v54, %v3877_v40  ;;  %v3886_v0 = vunpack.i.l.bf16 %v5474_v52  ;;  %v5708_v14 = vld [vmem:[#allocation17_spill] sm:$0xff] }
 0x230   : > { %3448 = vmatprep.subr.bf16.mxu1 %v3967_v9  ;;  %v3910_v19 = vpop.permute.xlu1 %3909  ;;  %v3897_v30 = vunpack.i.h.bf16 %v3895_v48  ;;  %v3896_v60 = vunpack.i.l.bf16 %v3895_v48  ;;  %v2119_v3 = vsel %vm1185_vm6, %v2117_v34, %v2118_v38  ;;  %v2129_v5 = vrot.slane %v2036_v58, 1  ;;  %v5711_v38 = vld [vmem:[#allocation25_spill] sm:$0xff] }
 0x231   : > { %v2021_v20 = vsel %vm1634_vm9, %v2005_v63, %v3882_v55  ;;  %v3912_v42 = vunpack.i.h.bf16 %v3910_v19  ;;  %v3911_v51 = vunpack.i.l.bf16 %v3910_v19  ;;  %v1968_v33 = vsel %vm982_vm4, %v4798_v36, %v3876_v15  ;;  %v5704_v55 = vld [vmem:[#allocation12_spill] sm:$0xff] }
 0x232   : > { %v2037_v25 = vsel %vm1643_vm10, %v2021_v20, %v3892_v16  ;;  %v2006_v46 = vsel %vm982_vm4, %v1841_v35, %v3896_v60  ;;  %v2007_v2 = vsel %vm982_vm4, %v1841_v35, %v3897_v30  ;;  %v2186_v22 = vpack.c.bf16 %v2119_v3, %v5499_v29  ;;  %v5707_v16 = vld [vmem:[#allocation18_spill] sm:$0xff] }
 0x233   : > { %v3900_v37 = vpop.permute.xlu0 %3899  ;;  %3449 = vmatpush3.bf16.msra.mxu1 %v3967_v9  ;;  %v2130_v13 = vrot.slane %v2037_v25, 1  ;;  %v1988_v52 = vsel %vm1643_vm10, %v1977_v53, %v3911_v51  ;;  %v1979_v24 = vsel %vm1634_vm9, %v1968_v33, %v3886_v0  ;;  %v1980_v39 = vsel %vm1634_vm9, %v1969_v12, %v3887_v62 }
 0x234   : > { %v3902_v45 = vunpack.i.h.bf16 %v3900_v37  ;;  %v3901_v18 = vunpack.i.l.bf16 %v3900_v37  ;;  %v2126_v48 = vrot.slane %v1988_v52, 1  ;;  %v5712_v34 = vpack.c.bf16 %v5710_v23, %v5711_v38 }
 0x235   : > { %v2131_v61 = vsel %vm1185_vm6, %v2129_v5, %v2130_v13  ;;  %v5713_v40 = vpack.c.bf16 %v4879_v26, %v4833_v27 }
 0x236   : > { %2779 = vmatmul.mubr.bf16.gmra.mrb[36].mxu1 %v2179_v50  ;;  %v2022_v8 = vsel %vm1634_vm9, %v2006_v46, %v3901_v18  ;;  %v2023_v54 = vsel %vm1634_vm9, %v2007_v2, %v3902_v45  ;;  %v1989_v50 = vsel %vm1643_vm10, %v1978_v32, %v3912_v42  ;;  %v5706_v32 = vpack.c.bf16 %v5704_v55, %v5705_v47 }
 0x237   : > { %2786 = vmatprep.mubr.bf16.mxu1 %v2187_v11  ;;  %v3905_v57 = vpop.permute.xlu0 %3904  ;;  %v2127_v41 = vrot.slane %v1989_v50, 1  ;;  %v5709_v11 = vpack.c.bf16 %v5707_v16, %v5708_v14 }
 0x238   : > { %v3907_v28 = vunpack.i.h.bf16 %v3905_v57  ;;  %v3906_v56 = vunpack.i.l.bf16 %v3905_v57 }
 0x239   : > { %v2128_v49 = vsel %vm1185_vm6, %v2126_v48, %v2127_v41 }
 0x23a   : > { %v2038_v9 = vsel %vm1643_vm10, %v2022_v8, %v3906_v56  ;;  %v2039_v1 = vsel %vm1643_vm10, %v2023_v54, %v3907_v28 }
 0x23b   : > { %v2138_v6 = vrot.slane %v2038_v9, 1  ;;  %v2139_v31 = vrot.slane %v2039_v1, 1  ;;  %v3915_v43 = vpop.permute.xlu0 %3914 }
 0x23c   : > { %v3917_v4 = vunpack.i.h.bf16 %v3915_v43  ;;  %v3916_v35 = vunpack.i.l.bf16 %v3915_v43 }
 0x23d   : > { %v2140_v7 = vsel %vm1185_vm6, %v2138_v6, %v2139_v31 }
 0x23e   : > { %2787 = vmatmul.mubr.bf16.gmra.mrb[40].mxu1 %v2186_v22  ;;  %v1991_v36 = vsel %vm1643_vm10, %v1980_v39, %v3917_v4  ;;  %v1990_v21 = vsel %vm1643_vm10, %v1979_v24, %v3916_v35  ;;  %v2194_v59 = vpack.c.bf16 %v2140_v7, %v2131_v61 }
 0x23f   : > { %v2136_v29 = vrot.slane %v1991_v36, 1  ;;  %v2135_v17 = vrot.slane %v1990_v21, 1 }
 0x240   : > { %2794 = vmatprep.mubr.bf16.mxu1 %v2194_v59 }
 0x241   : > { %v2137_v44 = vsel %vm1185_vm6, %v2135_v17, %v2136_v29 }
 0x242   : > { %v2193_v53 = vpack.c.bf16 %v2137_v44, %v2128_v49 }
 0x246   : > { %2795 = vmatmul.mubr.bf16.gmra.mrb[44].mxu1 %v2193_v53 }
 0x247   : > { %3450 = vmatprep.mubr.msk.bf16.mxu1 %vm982_vm4, %v5706_v32 }
 0x24e   : > { %3451 = vmatmul.mubr.msk.bf16.vlgmr.msra.gmra.mrb[48].mxu1 %vm982_vm4, %v5709_v11 }
 0x24f   : > { %3454 = vmatprep.mubr.msk.bf16.mxu1 %vm982_vm4, %v5712_v34 }
 0x256   : > { %3455 = vmatmul.mubr.msk.bf16.gmra.mrb[52].mxu1 %vm982_vm4, %v5713_v40 }
 0x275   : > { %v3220_v19 = vpop.f32.mrb[0].mxu1 }
 0x276   : > { %v3221_v37 = vpop.f32.mrb[1].mxu1 }
 0x277   : > { %v3222_v63 = vadd.f32 %v3221_v37, %v3220_v19  ;;  %v3223_v15 = vpop.f32.mrb[2].mxu1 }
 0x278   : > { %v3224_v30 = vpop.f32.mrb[3].mxu1 }
 0x279   : > { %v3225_v60 = vadd.f32 %v3224_v30, %v3223_v15 }
 0x297   : > { %v3226_v20 = vpop.f32.mrb[4].mxu1 }
 0x298   : > { %v3227_v10 = vpop.f32.mrb[5].mxu1 }
 0x299   : > { %v3228_v45 = vadd.f32 %v3227_v10, %v3226_v20  ;;  %v3229_v18 = vpop.f32.mrb[6].mxu1 }
 0x29a   : > { %v3230_v58 = vpop.f32.mrb[7].mxu1 }
 0x29b   : > { %v3231_v25 = vadd.f32 %v3230_v58, %v3229_v18 }
 0x2b9   : > { %v3232_v42 = vpop.f32.mrb[8].mxu1 }
 0x2ba   : > { %v3233_v51 = vpop.f32.mrb[9].mxu1 }
 0x2bb   : > { %v3234_v12 = vadd.f32 %v3233_v51, %v3232_v42  ;;  %v3235_v62 = vpop.f32.mrb[10].mxu1 }
 0x2bc   : > { %v3236_v0 = vpop.f32.mrb[11].mxu1 }
 0x2bd   : > { %v3237_v26 = vadd.f32 %v3236_v0, %v3235_v62 }
 0x2d7   : > { %v3238_v27 = vpop.f32.mrb[12].mxu1 }
 0x2d8   : > { %v3239_v57 = vpop.f32.mrb[13].mxu1 }
 0x2d9   : > { %v3240_v3 = vadd.f32 %v3239_v57, %v3238_v27  ;;  %v3241_v46 = vpop.f32.mrb[14].mxu1 }
 0x2da   : > { %v3242_v2 = vpop.f32.mrb[15].mxu1 }
 0x2db   : > { %v3243_v28 = vadd.f32 %v3242_v2, %v3241_v46 }
 0x2e1   : > { %v3260_v56 = vpop.f32.mrb[16].mxu1 }
 0x2e2   : > { %v3261_v5 = vpop.f32.mrb[17].mxu1 }
 0x2e3   : > { %v3262_v13 = vadd.f32 %v3261_v5, %v3260_v56  ;;  %v3263_v8 = vpop.f32.mrb[18].mxu1 }
 0x2e4   : > { %v3264_v54 = vpop.f32.mrb[19].mxu1 }
 0x2e5   : > { %v2708_v50 = vadd.f32 %v3262_v13, %v3222_v63  ;;  %v3265_v52 = vadd.f32 %v3264_v54, %v3263_v8 }
 0x2e7   : > { %v2711_v9 = vadd.f32 %v3265_v52, %v3225_v60 }
 0x2e9   : > { %v3266_v1 = vpop.f32.mrb[20].mxu1 }
 0x2ea   : > { %v3267_v33 = vpop.f32.mrb[21].mxu1 }
 0x2eb   : > { %v3268_v6 = vadd.f32 %v3267_v33, %v3266_v1  ;;  %v3269_v31 = vpop.f32.mrb[22].mxu1 }
 0x2ec   : > { %v3270_v22 = vpop.f32.mrb[23].mxu1 }
 0x2ed   : > { %v2716_v43 = vadd.f32 %v3268_v6, %v3228_v45  ;;  %v3271_v24 = vadd.f32 %v3270_v22, %v3269_v31 }
 0x2ef   : > { %v2719_v39 = vadd.f32 %v3271_v24, %v3231_v25 }
 0x2f1   : > { %v3272_v4 = vpop.f32.mrb[24].mxu1 }
 0x2f2   : > { %v3273_v35 = vpop.f32.mrb[25].mxu1 }
 0x2f3   : > { %v3274_v41 = vadd.f32 %v3273_v35, %v3272_v4  ;;  %v3275_v48 = vpop.f32.mrb[26].mxu1 }
 0x2f4   : > { %v3276_v61 = vpop.f32.mrb[27].mxu1 }
 0x2f5   : > { %v2724_v7 = vadd.f32 %v3274_v41, %v3234_v12  ;;  %v3277_v36 = vadd.f32 %v3276_v61, %v3275_v48  ;;  %v3121_v48 = vld [vmem:[%s5634_s4] ss:$0 sm:$0xff] }
 0x2f7   : > { %v2727_v21 = vadd.f32 %v3277_v36, %v3237_v26 }
 0x2f9   : > { %v3278_v59 = vpop.f32.mrb[28].mxu1 }
 0x2fa   : > { %v3279_v29 = vpop.f32.mrb[29].mxu1 }
 0x2fb   : > { %v3280_v17 = vadd.f32 %v3279_v29, %v3278_v59  ;;  %v3281_v49 = vpop.f32.mrb[30].mxu1 }
 0x2fc   : > { %v3282_v44 = vpop.f32.mrb[31].mxu1 }
 0x2fd   : > { %v2732_v53 = vadd.f32 %v3280_v17, %v3240_v3  ;;  %v3283_v55 = vadd.f32 %v3282_v44, %v3281_v49 }
 0x2ff   : > { %v2735_v47 = vadd.f32 %v3283_v55, %v3243_v28 }
 0x301   : > { %v3300_v32 = vpop.f32.mrb[32].mxu1 }
 0x302   : > { %v3301_v16 = vpop.f32.mrb[33].mxu1 }
 0x303   : > { %v3302_v14 = vadd.f32 %v3301_v16, %v3300_v32  ;;  %v3303_v11 = vpop.f32.mrb[34].mxu1 }
 0x304   : > { %v3304_v23 = vpop.f32.mrb[35].mxu1 }
 0x305   : > { %v3305_v38 = vadd.f32 %v3304_v23, %v3303_v11  ;;  %v2773_v34 = vadd.f32 %v3302_v14, %v2708_v50 }
 0x307   : > { %v2776_v40 = vadd.f32 %v3305_v38, %v2711_v9 }
 0x309   : > { %v3306_v19 = vpop.f32.mrb[36].mxu1 }
 0x30a   : > { %v3307_v37 = vpop.f32.mrb[37].mxu1 }
 0x30b   : > { %v3308_v63 = vadd.f32 %v3307_v37, %v3306_v19  ;;  %v3309_v15 = vpop.f32.mrb[38].mxu1 }
 0x30c   : > { %v3310_v30 = vpop.f32.mrb[39].mxu1 }
 0x30d   : > { %v3311_v60 = vadd.f32 %v3310_v30, %v3309_v15  ;;  %v2781_v20 = vadd.f32 %v3308_v63, %v2716_v43 }
 0x30f   : > { %v2784_v10 = vadd.f32 %v3311_v60, %v2719_v39 }
 0x311   : > { %v3312_v45 = vpop.f32.mrb[40].mxu1 }
 0x312   : > { %v3313_v18 = vpop.f32.mrb[41].mxu1 }
 0x313   : > { %v3314_v58 = vadd.f32 %v3313_v18, %v3312_v45  ;;  %v3315_v25 = vpop.f32.mrb[42].mxu1 }
 0x314   : > { %v3316_v42 = vpop.f32.mrb[43].mxu1 }
 0x315   : > { %v3317_v51 = vadd.f32 %v3316_v42, %v3315_v25  ;;  %v2789_v12 = vadd.f32 %v3314_v58, %v2724_v7 }
 0x317   : > { %v2792_v62 = vadd.f32 %v3317_v51, %v2727_v21 }
 0x319   : > { %v3318_v0 = vpop.f32.mrb[44].mxu1 }
 0x31a   : > { %v3319_v26 = vpop.f32.mrb[45].mxu1 }
 0x31b   : > { %v3320_v27 = vadd.f32 %v3319_v26, %v3318_v0  ;;  %v3321_v57 = vpop.f32.mrb[46].mxu1 }
 0x31c   : > { %v3322_v3 = vpop.f32.mrb[47].mxu1 }
 0x31d   : > { %v3323_v46 = vadd.f32 %v3322_v3, %v3321_v57  ;;  %v2797_v2 = vadd.f32 %v3320_v27, %v2732_v53 }
 0x31f   : > { %v2800_v28 = vadd.f32 %v3323_v46, %v2735_v47 }
 0x321   : > { %v3452_v56 = vpop.f32.mrb[48].mxu1 }
 0x322   : > { %v2846_v5 = vadd.f32 %v3452_v56, %v2781_v20  ;;  %v2837_v13 = vpop.f32.mrb[49].mxu1 }
 0x323   : > { %v2838_v8 = vadd.f32 %v2837_v13, %v2773_v34  ;;  %v3453_v54 = vpop.f32.mrb[50].mxu1 }
 0x324   : > { %v2849_v50 = vadd.f32 %v3453_v54, %v2784_v10  ;;  %v2840_v52 = vpop.f32.mrb[51].mxu1 }
 0x325   : > { %v2841_v9 = vadd.f32 %v2840_v52, %v2776_v40 }
 0x326   : > { %v2869_v1 = vmax.f32 %v2846_v5, %v2849_v50 }
 0x327   : > { %v2868_v33 = vmax.f32 %v2838_v8, %v2841_v9 }
 0x328   : > { %2873 = vst.msk [vmem:[#allocation3 + $0x8] sm:$0xff] %vm1634_vm9, %v2869_v1 }
 0x329   : > { %2872 = vst.msk [vmem:[#allocation3] sm:$0xff] %vm1634_vm9, %v2868_v33  ;;  %v3456_v6 = vpop.f32.mrb[52].mxu1 }
 0x32a   : > { %v2862_v31 = vadd.f32 %v3456_v6, %v2797_v2  ;;  %v2853_v22 = vpop.f32.mrb[53].mxu1 }
 0x32b   : > { %v2854_v43 = vadd.f32 %v2853_v22, %v2789_v12  ;;  %v3457_v24 = vpop.f32.mrb[54].mxu1 }
 0x32c   : > { %v2865_v39 = vadd.f32 %v3457_v24, %v2800_v28  ;;  %v2856_v4 = vpop.f32.mrb[55].mxu1 }
 0x32d   : > { %v2857_v35 = vadd.f32 %v2856_v4, %v2792_v62 }
 0x32e   : > { %v2871_v41 = vmax.f32 %v2862_v31, %v2865_v39 }
 0x32f   : > { %v2870_v61 = vmax.f32 %v2854_v43, %v2857_v35  ;;  %v2878_v7 = vld [vmem:[#allocation3 + $0x8] ss:$2 sm:$0xf]  ;;  %v2886_v36 = vld [vmem:[#allocation3 + $0x9] ss:$2 sm:$0xf] }
 0x330   : > { %2875 = vst.msk [vmem:[#allocation3 + $0x18] sm:$0xff] %vm1634_vm9, %v2871_v41  ;;  %v2876_v21 = vld [vmem:[#allocation3] ss:$2 sm:$0xf]  ;;  %v2892_v29 = vmax.f32 %v2878_v7, %v2886_v36 }
 0x331   : > { %v2884_v59 = vld [vmem:[#allocation3 + $0x1] ss:$2 sm:$0xf]  ;;  %2874 = vst.msk [vmem:[#allocation3 + $0x10] sm:$0xff] %vm1634_vm9, %v2870_v61 }
 0x332   : > { %v2891_v17 = vmax.f32 %v2876_v21, %v2884_v59  ;;  %v2903_v49 = vadd.f32 %v3121_v48, %v2892_v29 }
 0x334   : > { %v2902_v44 = vadd.f32 %v3121_v48, %v2891_v17  ;;  %2908 = vst.msk [vmem:[%s217_s8 + $0x4] sm:$0xf] %vm2906_vm11, %v2903_v49 }
 0x336   : > { %2907 = vst.msk [vmem:[%s217_s8] sm:$0xf] %vm2906_vm11, %v2902_v44 }
 0x337   : > { %v2882_v53 = vld [vmem:[#allocation3 + $0x18] ss:$2 sm:$0xf]  ;;  %v2890_v55 = vld [vmem:[#allocation3 + $0x19] ss:$2 sm:$0xf] }
 0x338   : > { %v2880_v47 = vld [vmem:[#allocation3 + $0x10] ss:$2 sm:$0xf]  ;;  %v2888_v32 = vld [vmem:[#allocation3 + $0x11] ss:$2 sm:$0xf]  ;;  %v2894_v16 = vmax.f32 %v2882_v53, %v2890_v55 }
 0x339   : > { %v2893_v14 = vmax.f32 %v2880_v47, %v2888_v32 }
 0x33a   : > { %v2905_v11 = vadd.f32 %v3121_v48, %v2894_v16 }
 0x33b   : > { %v2904_v23 = vadd.f32 %v3121_v48, %v2893_v14 }
 0x33c   : > { %2910 = vst.msk [vmem:[%s217_s8 + $0xc] sm:$0xf] %vm2906_vm11, %v2905_v11 }
 0x33d   : > { %2909 = vst.msk [vmem:[%s217_s8 + $0x8] sm:$0xf] %vm2906_vm11, %v2904_v23 }
 0x33e   : > { %3981 = shalt.err (!%p3978_p3)
}
 0x33f   : > { %s3982_s23 = scalar_lea.hbm %s5579_s13, 256  ;;  %s3986_s6 = scalar_lea.hbm %s5635_s5, 512 }
 0x340   : > { %p3983_p4 = scmp.ne.s32.totalorder %s5579_s13, %s3982_s23  ;;  %p3987_p9 = scmp.lt.u32.totalorder %s5579_s13, %s5635_s5 }
 0x341   : > { %p3988_p10 = scmp.lt.u32.totalorder %s3986_s6, %s3982_s23  ;;  %p3990_p12 = scmp.lt.u32.totalorder %s3982_s23, %s5579_s13 }
 0x342   : > { %p3984_p7 = pnand %p3983_p4, %p4106_p5 }
 0x343   : > { %p3989_p11 = por %p3988_p10, %p3987_p9 }
 0x344   : > { %p3985_p8 = pneg %p3984_p7 }
 0x345   : > { %p3991_p13 = por %p3990_p12, %p3989_p11 }
 0x347   : > { %p3992_p0 = pnand %p3991_p13, %p3985_p8 }
 0x349   : > { %3995 = shalt.err (!%p3992_p0)
}
 0x34a   : > { %s4037_s9 = smov 4  }
 0x34b   : > { %3469 = dma.vmem_to_hbm [thread:$0]  (%p4106_p5), %s5581_s10, 256, %s5579_s13, %s5587_s22, %s4033_s16, %s4033_s16, %s4037_s9  }
 0x34c PF: > { %p3475_p1 = scmp.ge.s32.totalorder %s4030_s21, 2  ;;  %s2940_s11 = sand.u32 1, %s4018_s18  }
 0x34d   : > { %s2941_s12 = scalar_lea.sflag [#allocation5], %s2940_s11 }
 0x34e   : > { %p3472_p2 = pnand %p3475_p1, %p4110_p6 }
 0x350   : > { %4013 = dma.done.wait (!%p3472_p2), %s2941_s12, 256  }
 0x351   : > { %4015 = vsyncadd (!%p3472_p2), %s2941_s12, 4294967040  ;;  %p15_p3 = scmp.ge.s32.totalorder %s4093_s24, 4   ;;  %s5714_s18 = smov %s4022_s19 }
 0x352   : > { %s5715_s19 = smov %s4026_s20  ;;  %s5716_s20 = smov %s4104_s27 }
 0x353   : > { %s5717_s21 = smov %s4093_s24  ;;  %17 = sbr.rel (!%p15_p3) target bundleno = 3 (0x3), region = 129 }
 0x35a   :  { %2946 = vsyncpa [#allocation5], 1 }
 0x35b   :  { %2948 = vsyncpa [#allocation5 + $0x1], 1 }

</bundles_post_ra>
